<compile_context>
chip_gen: v6e
topology: v6e:2x2x1
jax: 0.10.0
libtpu: 0.0.40
codegen_flags: <defaults>
</compile_context>

<pallas_src>
import functools

import jax
import jax.numpy as jnp
from jax.experimental import pallas as pl
from jax.experimental.pallas import tpu as pltpu

LANE = 128       # pad channel dims to a multiple of the lane width
SUBLANE = 8
_COL0 = 8        # interior columns start at this sublane-aligned scratch offset


def _round_up(x, m):
    return (x + m - 1) // m * m


def _pick_row_tile(h, w, chid_p):
    """Largest row tile that divides h and keeps the conv scratch modest."""
    budget = 6 * 1024 * 1024
    for t in (32, 16, 8, 4, 2, 1):
        if h % t == 0 and (t + 2) * (w + 2 * _COL0) * chid_p * 4 <= budget:
            return t
    return 1


def _mixffn_kernel(x_ref, w1_ref, b1_ref, wdw_ref, bdw_ref, w2_ref, b2_ref,
                   out_ref, conv_ref, *, H, W, TH):
    """One (batch, row-tile) step: fc1 -> depthwise 3x3 -> GELU -> fc2.

    x_ref    : (H*W, Cin)  bf16   full image for this batch (fetched once per b)
    out_ref  : (TH*W, Cout) f32   this row tile's output tokens
    conv_ref : (TH+2, W+16, Chid) f32 scratch; image col c lives at column
               _COL0 + c, guard columns _COL0-1 and _COL0+W are kept zero.
    """
    Chid = w1_ref.shape[1]
    r = pl.program_id(1)
    n_r = pl.num_programs(1)
    row0 = r * TH                                    # first image row of this tile

    def _align(v):                                   # alignment hint for pl.ds starts
        return pl.multiple_of(v, SUBLANE) if W % SUBLANE == 0 else v

    w1 = w1_ref[...]                                 # (Cin, Chid) bf16
    b1 = b1_ref[...]                                 # (1, Chid)   f32

    # ---- fc1 on the TH interior rows (bf16 MXU, f32 accumulation) ----
    x_int = x_ref[pl.ds(_align(row0 * W), TH * W), :]                  # (TH*W, Cin)
    h_int = jnp.dot(x_int, w1, preferred_element_type=jnp.float32) + b1

    # ---- fc1 on the two halo rows (clamped reads; masked to 0 at image edges) ----
    top_row = jnp.maximum(row0 - 1, 0)
    bot_row = jnp.minimum(row0 + TH, H - 1)
    x_top = x_ref[pl.ds(_align(top_row * W), W), :]                    # (W, Cin)
    x_bot = x_ref[pl.ds(_align(bot_row * W), W), :]
    h_top = jnp.dot(x_top, w1, preferred_element_type=jnp.float32) + b1
    h_bot = jnp.dot(x_bot, w1, preferred_element_type=jnp.float32) + b1
    h_top = h_top * (r > 0).astype(jnp.float32)          # image row -1 -> zero pad
    h_bot = h_bot * (r < n_r - 1).astype(jnp.float32)    # image row H  -> zero pad

    # ---- stage the (TH+2, W, Chid) halo tile (aligned, lane-dense stores) ----
    conv_ref[0:1, _COL0:_COL0 + W, :] = h_top.reshape(1, W, Chid)
    conv_ref[1:TH + 1, _COL0:_COL0 + W, :] = h_int.reshape(TH, W, Chid)
    conv_ref[TH + 1:TH + 2, _COL0:_COL0 + W, :] = h_bot.reshape(1, W, Chid)
    # only the two guard columns the taps touch need zeroing (narrow stores)
    zcol = jnp.zeros((TH + 2, 1, Chid), jnp.float32)
    conv_ref[:, _COL0 - 1:_COL0, :] = zcol
    conv_ref[:, _COL0 + W:_COL0 + W + 1, :] = zcol

    # ---- depthwise 3x3 conv, padding=1, groups=Chid (9 shifted taps) ----
    wdw = wdw_ref[...]                                    # (3, 3, Chid) f32
    acc = jnp.zeros((TH, W, Chid), jnp.float32)
    for di in range(3):
        for dj in range(3):
            acc = acc + wdw[di, dj] * conv_ref[
                di:di + TH, _COL0 - 1 + dj:_COL0 - 1 + dj + W, :]
    acc = acc + bdw_ref[...]                              # (1,1,Chid) broadcast

    # ---- exact GELU (matches torch.nn.functional.gelu default) ----
    y = 0.5 * acc * (1.0 + jax.lax.erf(acc * 0.7071067811865476))

    # dropout(p=0.0) -> identity
    # TODO(synk): dropout_p > 0 (training-mode RNG masking) is not implemented.

    # ---- fc2 (bf16 MXU, f32 accumulation), lane-dense output store ----
    yb = y.reshape(TH * W, Chid).astype(jnp.bfloat16)
    out = jnp.dot(yb, w2_ref[...], preferred_element_type=jnp.float32) + b2_ref[...]
    out_ref[...] = out.astype(out_ref.dtype)


def mix_feed_forward(x, params, h, w, *, row_tile=None):
    """x: (B, h*w, C_in) float32. Returns (B, h*w, C_out) float32."""
    B, HW, Cin = x.shape
    assert HW == h * w, "token count must equal h*w"
    w1, b1, wdw, bdw, w2, b2 = (params["w1"], params["b1"], params["wdw"],
                                params["bdw"], params["w2"], params["b2"])
    Chid, Cout = w1.shape[1], w2.shape[1]

    # --- lane-dense channel padding (zero padding is numerically exact) ---
    Cin_p, Chid_p, Cout_p = (_round_up(c, LANE) for c in (Cin, Chid, Cout))
    xp = jnp.pad(x, ((0, 0), (0, 0), (0, Cin_p - Cin))).astype(jnp.bfloat16)
    w1p = jnp.pad(w1, ((0, Cin_p - Cin), (0, Chid_p - Chid))).astype(jnp.bfloat16)
    b1p = jnp.pad(b1, ((0, 0), (0, Chid_p - Chid)))
    wdwp = jnp.pad(wdw, ((0, 0), (0, 0), (0, Chid_p - Chid)))
    bdwp = jnp.pad(bdw, ((0, 0), (0, 0), (0, Chid_p - Chid)))
    w2p = jnp.pad(w2, ((0, Chid_p - Chid), (0, Cout_p - Cout))).astype(jnp.bfloat16)
    b2p = jnp.pad(b2, ((0, 0), (0, Cout_p - Cout)))

    # --- row tiling of the token axis, 1-row halo for the 3x3 conv ---
    TH = _pick_row_tile(h, w, Chid_p) if row_tile is None else row_tile
    assert h % TH == 0, "row_tile must divide h"
    nR = h // TH

    kernel = functools.partial(_mixffn_kernel, H=h, W=w, TH=TH)

    flops = 2 * B * HW * (Cin_p * Chid_p + 9 * Chid_p + Chid_p * Cout_p)
    bytes_accessed = (xp.size * 2 + w1p.size * 2 + w2p.size * 2
                      + b1p.size * 4 + wdwp.size * 4 + bdwp.size * 4
                      + b2p.size * 4 + B * HW * Cout_p * 4)

    out = pl.pallas_call(
        kernel,
        out_shape=jax.ShapeDtypeStruct((B, HW, Cout_p), jnp.float32),
        grid_spec=pltpu.PrefetchScalarGridSpec(
            num_scalar_prefetch=0,
            grid=(B, nR),
            in_specs=[
                # x: full image per batch (constant over r -> fetched once per b).
                pl.BlockSpec((None, HW, Cin_p), lambda b, r: (b, 0, 0)),
                # weights/biases have constant index_maps -> fetched once.
                pl.BlockSpec((Cin_p, Chid_p), lambda b, r: (0, 0)),
                pl.BlockSpec((1, Chid_p), lambda b, r: (0, 0)),
                pl.BlockSpec((3, 3, Chid_p), lambda b, r: (0, 0, 0)),
                pl.BlockSpec((1, 1, Chid_p), lambda b, r: (0, 0, 0)),
                pl.BlockSpec((Chid_p, Cout_p), lambda b, r: (0, 0)),
                pl.BlockSpec((1, Cout_p), lambda b, r: (0, 0)),
            ],
            out_specs=pl.BlockSpec((None, TH * w, Cout_p), lambda b, r: (b, r, 0)),
            scratch_shapes=[
                pltpu.VMEM((TH + 2, w + 2 * _COL0, Chid_p), jnp.float32)],
        ),
        compiler_params=pltpu.CompilerParams(
            dimension_semantics=("parallel", "parallel"),
            vmem_limit_bytes=64 * 1024 * 1024),
        cost_estimate=pl.CostEstimate(flops=flops,
                                      transcendentals=B * HW * Chid_p,
                                      bytes_accessed=bytes_accessed),
    )(xp, w1p, b1p, wdwp, bdwp, w2p, b2p)

    return out[:, :, :Cout]


def init_params(key, in_features, hidden_features, out_features):
    """Deterministic synthetic parameters (shapes match the nn.Module)."""
    k1, k2, k3, k4, k5, k6 = jax.random.split(key, 6)
    s = 0.05
    # nn.Linear(in, hidden): torch weight is (hidden, in); store transposed.
    w1 = jax.random.normal(k1, (in_features, hidden_features), jnp.float32) * s
    b1 = jax.random.normal(k2, (1, hidden_features), jnp.float32) * s
    # nn.Conv2d(hidden, hidden, 3, groups=hidden): torch weight (hidden,1,3,3);
    # stored as (3, 3, hidden).
    wdw = jax.random.normal(k3, (3, 3, hidden_features), jnp.float32) * s
    bdw = jax.random.normal(k4, (1, 1, hidden_features), jnp.float32) * s
    # nn.Linear(hidden, out): stored transposed (hidden, out).
    w2 = jax.random.normal(k5, (hidden_features, out_features), jnp.float32) * s
    b2 = jax.random.normal(k6, (1, out_features), jnp.float32) * s
    return dict(w1=w1, b1=b1, wdw=wdw, bdw=bdw, w2=w2, b2=b2)


def reference(x, params, h, w):
    """Pure-JAX f32 reference mirroring the PyTorch forward (dropout p=0)."""
    B, HW, _ = x.shape
    h1 = x @ params["w1"] + params["b1"]                          # (B, HW, Chid)
    Chid = h1.shape[-1]
    img = h1.reshape(B, h, w, Chid)
    img = jnp.pad(img, ((0, 0), (1, 1), (1, 1), (0, 0)))
    acc = jnp.zeros((B, h, w, Chid), jnp.float32)
    for di in range(3):
        for dj in range(3):
            acc = acc + params["wdw"][di, dj] * img[:, di:di + h, dj:dj + w, :]
    acc = acc + params["bdw"][0]
    y = acc.reshape(B, HW, Chid)
    y = 0.5 * y * (1.0 + jax.lax.erf(y / jnp.sqrt(2.0)))
    return y @ params["w2"] + params["b2"]


if __name__ == "__main__":
    # Small demo shapes: 3 row tiles (top / middle / bottom) exercise the halo
    # masking paths; channels are padded to 128 lanes inside the wrapper.
    B, H, W = 2, 24, 16
    in_features, hidden_features, out_features = 32, 64, 32

    key = jax.random.PRNGKey(0)
    kx, kp = jax.random.split(key)
    x = jax.random.normal(kx, (B, H * W, in_features), jnp.float32)
    params = init_params(kp, in_features, hidden_features, out_features)

    out = mix_feed_forward(x, params, H, W, row_tile=8)
    out = jax.block_until_ready(out)

    ref = reference(x, params, H, W)
    assert out.shape == (B, H * W, out_features)
    # bf16 matmul inputs (f32 accumulation) -> slightly looser tolerance than f32.
    assert jnp.allclose(out, ref, rtol=5e-2, atol=5e-3), "mismatch vs reference"

    print("KERNEL_OK")
</pallas_src>

<mosaic_0001>
module attributes {stable_mosaic.version = 11 : i64} {
  func.func @_mixffn_kernel(%arg0: i32, %arg1: i32, %arg2: memref<1x384x128xbf16, #tpu.memory_space<vmem>>, %arg3: memref<128x128xbf16, #tpu.memory_space<vmem>>, %arg4: memref<1x128xf32, #tpu.memory_space<vmem>>, %arg5: memref<3x3x128xf32, #tpu.memory_space<vmem>>, %arg6: memref<1x1x128xf32, #tpu.memory_space<vmem>>, %arg7: memref<128x128xbf16, #tpu.memory_space<vmem>>, %arg8: memref<1x128xf32, #tpu.memory_space<vmem>>, %arg9: memref<1x128x128xf32, #tpu.memory_space<vmem>>, %arg10: memref<10x32x128xf32, #tpu.memory_space<vmem>>) attributes {dimension_semantics = [#tpu.dimension_semantics<parallel>, #tpu.dimension_semantics<parallel>], iteration_bounds = array<i64: 2, 3>, scalar_prefetch = 0 : i64, scratch_operands = 1 : i64, tpu.core_type = #tpu.core_type<tc>, window_params = [{transform_indices = @transform_0, window_bounds = array<i64: 1, 384, 128>}, {pipeline_mode = #tpu.pipeline_mode<synchronous>, transform_indices = @transform_1, window_bounds = array<i64: 128, 128>}, {pipeline_mode = #tpu.pipeline_mode<synchronous>, transform_indices = @transform_2, window_bounds = array<i64: 1, 128>}, {pipeline_mode = #tpu.pipeline_mode<synchronous>, transform_indices = @transform_3, window_bounds = array<i64: 3, 3, 128>}, {pipeline_mode = #tpu.pipeline_mode<synchronous>, transform_indices = @transform_4, window_bounds = array<i64: 1, 1, 128>}, {pipeline_mode = #tpu.pipeline_mode<synchronous>, transform_indices = @transform_5, window_bounds = array<i64: 128, 128>}, {pipeline_mode = #tpu.pipeline_mode<synchronous>, transform_indices = @transform_6, window_bounds = array<i64: 1, 128>}, {transform_indices = @transform_7, window_bounds = array<i64: 1, 128, 128>}]} {
    %c8_i32 = arith.constant 8 : i32
    %0 = arith.muli %arg1, %c8_i32 : i32
    %c0 = arith.constant 0 : index
    %c0_0 = arith.constant 0 : index
    %1 = vector.load %arg3[%c0, %c0_0] : memref<128x128xbf16, #tpu.memory_space<vmem>>, vector<128x128xbf16>
    %c0_1 = arith.constant 0 : index
    %c0_2 = arith.constant 0 : index
    %2 = vector.load %arg4[%c0_1, %c0_2] : memref<1x128xf32, #tpu.memory_space<vmem>>, vector<1x128xf32>
    %c16_i32 = arith.constant 16 : i32
    %3 = arith.muli %0, %c16_i32 : i32
    %4 = tpu.assume_multiple %3, 8 : i32
    %c0_3 = arith.constant 0 : index
    %5 = arith.index_cast %4 : i32 to index
    %c0_4 = arith.constant 0 : index
    %6 = vector.load %arg2[%c0_3, %5, %c0_4] : memref<1x384x128xbf16, #tpu.memory_space<vmem>>, vector<1x128x128xbf16>
    %7 = vector.shape_cast %6 : vector<1x128x128xbf16> to vector<128x128xbf16>
    %cst = arith.constant dense<0.000000e+00> : vector<128x128xf32>
    %8 = tpu.matmul %7, %1, %cst {dimension_numbers = #tpu.dot_dimension_numbers<[1], [0], [0], [1], [0, 0, 1, 1], [], []>} : vector<128x128xbf16>, vector<128x128xbf16>, vector<128x128xf32> -> vector<128x128xf32>
    %9 = vector.broadcast %2 : vector<1x128xf32> to vector<128x128xf32>
    %10 = arith.addf %8, %9 : vector<128x128xf32>
    %c1_i32 = arith.constant 1 : i32
    %11 = arith.subi %0, %c1_i32 : i32
    %c0_i32 = arith.constant 0 : i32
    %12 = arith.maxsi %11, %c0_i32 : i32
    %c8_i32_5 = arith.constant 8 : i32
    %13 = arith.addi %0, %c8_i32_5 : i32
    %c23_i32 = arith.constant 23 : i32
    %14 = arith.minsi %13, %c23_i32 : i32
    %c16_i32_6 = arith.constant 16 : i32
    %15 = arith.muli %12, %c16_i32_6 : i32
    %16 = tpu.assume_multiple %15, 8 : i32
    %c0_7 = arith.constant 0 : index
    %17 = arith.index_cast %16 : i32 to index
    %c0_8 = arith.constant 0 : index
    %18 = vector.load %arg2[%c0_7, %17, %c0_8] : memref<1x384x128xbf16, #tpu.memory_space<vmem>>, vector<1x16x128xbf16>
    %19 = vector.shape_cast %18 : vector<1x16x128xbf16> to vector<16x128xbf16>
    %c16_i32_9 = arith.constant 16 : i32
    %20 = arith.muli %14, %c16_i32_9 : i32
    %21 = tpu.assume_multiple %20, 8 : i32
    %c0_10 = arith.constant 0 : index
    %22 = arith.index_cast %21 : i32 to index
    %c0_11 = arith.constant 0 : index
    %23 = vector.load %arg2[%c0_10, %22, %c0_11] : memref<1x384x128xbf16, #tpu.memory_space<vmem>>, vector<1x16x128xbf16>
    %24 = vector.shape_cast %23 : vector<1x16x128xbf16> to vector<16x128xbf16>
    %cst_12 = arith.constant dense<0.000000e+00> : vector<16x128xf32>
    %25 = tpu.matmul %19, %1, %cst_12 {dimension_numbers = #tpu.dot_dimension_numbers<[1], [0], [0], [1], [0, 0, 1, 1], [], []>} : vector<16x128xbf16>, vector<128x128xbf16>, vector<16x128xf32> -> vector<16x128xf32>
    %26 = vector.broadcast %2 : vector<1x128xf32> to vector<16x128xf32>
    %27 = arith.addf %25, %26 : vector<16x128xf32>
    %cst_13 = arith.constant dense<0.000000e+00> : vector<16x128xf32>
    %28 = tpu.matmul %24, %1, %cst_13 {dimension_numbers = #tpu.dot_dimension_numbers<[1], [0], [0], [1], [0, 0, 1, 1], [], []>} : vector<16x128xbf16>, vector<128x128xbf16>, vector<16x128xf32> -> vector<16x128xf32>
    %29 = vector.broadcast %2 : vector<1x128xf32> to vector<16x128xf32>
    %30 = arith.addf %28, %29 : vector<16x128xf32>
    %c0_i32_14 = arith.constant 0 : i32
    %31 = arith.cmpi sgt, %arg1, %c0_i32_14 : i32
    %32 = arith.extui %31 : i1 to i32
    %33 = arith.sitofp %32 : i32 to f32
    %34 = vector.broadcast %33 : f32 to vector<16x128xf32>
    %35 = arith.mulf %27, %34 : vector<16x128xf32>
    %c2_i32 = arith.constant 2 : i32
    %36 = arith.cmpi slt, %arg1, %c2_i32 : i32
    %37 = arith.extui %36 : i1 to i32
    %38 = arith.sitofp %37 : i32 to f32
    %39 = vector.broadcast %38 : f32 to vector<16x128xf32>
    %40 = arith.mulf %30, %39 : vector<16x128xf32>
    %41 = vector.shape_cast %35 : vector<16x128xf32> to vector<1x16x128xf32>
    %c0_15 = arith.constant 0 : index
    %c8 = arith.constant 8 : index
    %c0_16 = arith.constant 0 : index
    %42 = vector.load %arg10[%c0_15, %c8, %c0_16] : memref<10x32x128xf32, #tpu.memory_space<vmem>>, vector<1x16x128xf32>
    tpu.vector_store %arg10[%c0_15, %c8, %c0_16], %41 {strides = array<i32>} : memref<10x32x128xf32, #tpu.memory_space<vmem>>, vector<1x16x128xf32>,
    %43 = vector.shape_cast %10 : vector<128x128xf32> to vector<8x16x128xf32>
    %c1 = arith.constant 1 : index
    %c8_17 = arith.constant 8 : index
    %c0_18 = arith.constant 0 : index
    %44 = vector.load %arg10[%c1, %c8_17, %c0_18] : memref<10x32x128xf32, #tpu.memory_space<vmem>>, vector<8x16x128xf32>
    tpu.vector_store %arg10[%c1, %c8_17, %c0_18], %43 {strides = array<i32>} : memref<10x32x128xf32, #tpu.memory_space<vmem>>, vector<8x16x128xf32>,
    %45 = vector.shape_cast %40 : vector<16x128xf32> to vector<1x16x128xf32>
    %c9 = arith.constant 9 : index
    %c8_19 = arith.constant 8 : index
    %c0_20 = arith.constant 0 : index
    %46 = vector.load %arg10[%c9, %c8_19, %c0_20] : memref<10x32x128xf32, #tpu.memory_space<vmem>>, vector<1x16x128xf32>
    tpu.vector_store %arg10[%c9, %c8_19, %c0_20], %45 {strides = array<i32>} : memref<10x32x128xf32, #tpu.memory_space<vmem>>, vector<1x16x128xf32>,
    %cst_21 = arith.constant 0.000000e+00 : f32
    %47 = vector.broadcast %cst_21 : f32 to vector<10x1x128xf32>
    %c0_22 = arith.constant 0 : index
    %c7 = arith.constant 7 : index
    %c0_23 = arith.constant 0 : index
    %48 = vector.load %arg10[%c0_22, %c7, %c0_23] : memref<10x32x128xf32, #tpu.memory_space<vmem>>, vector<10x1x128xf32>
    tpu.vector_store %arg10[%c0_22, %c7, %c0_23], %47 {strides = array<i32>} : memref<10x32x128xf32, #tpu.memory_space<vmem>>, vector<10x1x128xf32>,
    %c0_24 = arith.constant 0 : index
    %c24 = arith.constant 24 : index
    %c0_25 = arith.constant 0 : index
    %49 = vector.load %arg10[%c0_24, %c24, %c0_25] : memref<10x32x128xf32, #tpu.memory_space<vmem>>, vector<10x1x128xf32>
    tpu.vector_store %arg10[%c0_24, %c24, %c0_25], %47 {strides = array<i32>} : memref<10x32x128xf32, #tpu.memory_space<vmem>>, vector<10x1x128xf32>,
    %c0_26 = arith.constant 0 : index
    %c0_27 = arith.constant 0 : index
    %c0_28 = arith.constant 0 : index
    %50 = vector.load %arg5[%c0_26, %c0_27, %c0_28] : memref<3x3x128xf32, #tpu.memory_space<vmem>>, vector<3x3x128xf32>
    %cst_29 = arith.constant 0.000000e+00 : f32
    %51 = vector.broadcast %cst_29 : f32 to vector<8x16x128xf32>
    %52 = vector.extract_strided_slice %50 {offsets = [0, 0, 0], sizes = [1, 1, 128], strides = [1, 1, 1]} : vector<3x3x128xf32> to vector<1x1x128xf32>
    %53 = vector.shape_cast %52 : vector<1x1x128xf32> to vector<128xf32>
    %c0_30 = arith.constant 0 : index
    %c7_31 = arith.constant 7 : index
    %c0_32 = arith.constant 0 : index
    %54 = vector.load %arg10[%c0_30, %c7_31, %c0_32] : memref<10x32x128xf32, #tpu.memory_space<vmem>>, vector<8x16x128xf32>
    %55 = vector.shape_cast %53 : vector<128xf32> to vector<1x1x128xf32>
    %56 = vector.broadcast %55 : vector<1x1x128xf32> to vector<8x16x128xf32>
    %57 = arith.mulf %56, %54 : vector<8x16x128xf32>
    %58 = arith.addf %51, %57 : vector<8x16x128xf32>
    %59 = vector.extract_strided_slice %50 {offsets = [0, 1, 0], sizes = [1, 1, 128], strides = [1, 1, 1]} : vector<3x3x128xf32> to vector<1x1x128xf32>
    %60 = vector.shape_cast %59 : vector<1x1x128xf32> to vector<128xf32>
    %c0_33 = arith.constant 0 : index
    %c8_34 = arith.constant 8 : index
    %c0_35 = arith.constant 0 : index
    %61 = vector.load %arg10[%c0_33, %c8_34, %c0_35] : memref<10x32x128xf32, #tpu.memory_space<vmem>>, vector<8x16x128xf32>
    %62 = vector.shape_cast %60 : vector<128xf32> to vector<1x1x128xf32>
    %63 = vector.broadcast %62 : vector<1x1x128xf32> to vector<8x16x128xf32>
    %64 = arith.mulf %63, %61 : vector<8x16x128xf32>
    %65 = arith.addf %58, %64 : vector<8x16x128xf32>
    %66 = vector.extract_strided_slice %50 {offsets = [0, 2, 0], sizes = [1, 1, 128], strides = [1, 1, 1]} : vector<3x3x128xf32> to vector<1x1x128xf32>
    %67 = vector.shape_cast %66 : vector<1x1x128xf32> to vector<128xf32>
    %c0_36 = arith.constant 0 : index
    %c9_37 = arith.constant 9 : index
    %c0_38 = arith.constant 0 : index
    %68 = vector.load %arg10[%c0_36, %c9_37, %c0_38] : memref<10x32x128xf32, #tpu.memory_space<vmem>>, vector<8x16x128xf32>
    %69 = vector.shape_cast %67 : vector<128xf32> to vector<1x1x128xf32>
    %70 = vector.broadcast %69 : vector<1x1x128xf32> to vector<8x16x128xf32>
    %71 = arith.mulf %70, %68 : vector<8x16x128xf32>
    %72 = arith.addf %65, %71 : vector<8x16x128xf32>
    %73 = vector.extract_strided_slice %50 {offsets = [1, 0, 0], sizes = [1, 1, 128], strides = [1, 1, 1]} : vector<3x3x128xf32> to vector<1x1x128xf32>
    %74 = vector.shape_cast %73 : vector<1x1x128xf32> to vector<128xf32>
    %c1_39 = arith.constant 1 : index
    %c7_40 = arith.constant 7 : index
    %c0_41 = arith.constant 0 : index
    %75 = vector.load %arg10[%c1_39, %c7_40, %c0_41] : memref<10x32x128xf32, #tpu.memory_space<vmem>>, vector<8x16x128xf32>
    %76 = vector.shape_cast %74 : vector<128xf32> to vector<1x1x128xf32>
    %77 = vector.broadcast %76 : vector<1x1x128xf32> to vector<8x16x128xf32>
    %78 = arith.mulf %77, %75 : vector<8x16x128xf32>
    %79 = arith.addf %72, %78 : vector<8x16x128xf32>
    %80 = vector.extract_strided_slice %50 {offsets = [1, 1, 0], sizes = [1, 1, 128], strides = [1, 1, 1]} : vector<3x3x128xf32> to vector<1x1x128xf32>
    %81 = vector.shape_cast %80 : vector<1x1x128xf32> to vector<128xf32>
    %c1_42 = arith.constant 1 : index
    %c8_43 = arith.constant 8 : index
    %c0_44 = arith.constant 0 : index
    %82 = vector.load %arg10[%c1_42, %c8_43, %c0_44] : memref<10x32x128xf32, #tpu.memory_space<vmem>>, vector<8x16x128xf32>
    %83 = vector.shape_cast %81 : vector<128xf32> to vector<1x1x128xf32>
    %84 = vector.broadcast %83 : vector<1x1x128xf32> to vector<8x16x128xf32>
    %85 = arith.mulf %84, %82 : vector<8x16x128xf32>
    %86 = arith.addf %79, %85 : vector<8x16x128xf32>
    %87 = vector.extract_strided_slice %50 {offsets = [1, 2, 0], sizes = [1, 1, 128], strides = [1, 1, 1]} : vector<3x3x128xf32> to vector<1x1x128xf32>
    %88 = vector.shape_cast %87 : vector<1x1x128xf32> to vector<128xf32>
    %c1_45 = arith.constant 1 : index
    %c9_46 = arith.constant 9 : index
    %c0_47 = arith.constant 0 : index
    %89 = vector.load %arg10[%c1_45, %c9_46, %c0_47] : memref<10x32x128xf32, #tpu.memory_space<vmem>>, vector<8x16x128xf32>
    %90 = vector.shape_cast %88 : vector<128xf32> to vector<1x1x128xf32>
    %91 = vector.broadcast %90 : vector<1x1x128xf32> to vector<8x16x128xf32>
    %92 = arith.mulf %91, %89 : vector<8x16x128xf32>
    %93 = arith.addf %86, %92 : vector<8x16x128xf32>
    %94 = vector.extract_strided_slice %50 {offsets = [2, 0, 0], sizes = [1, 1, 128], strides = [1, 1, 1]} : vector<3x3x128xf32> to vector<1x1x128xf32>
    %95 = vector.shape_cast %94 : vector<1x1x128xf32> to vector<128xf32>
    %c2 = arith.constant 2 : index
    %c7_48 = arith.constant 7 : index
    %c0_49 = arith.constant 0 : index
    %96 = vector.load %arg10[%c2, %c7_48, %c0_49] : memref<10x32x128xf32, #tpu.memory_space<vmem>>, vector<8x16x128xf32>
    %97 = vector.shape_cast %95 : vector<128xf32> to vector<1x1x128xf32>
    %98 = vector.broadcast %97 : vector<1x1x128xf32> to vector<8x16x128xf32>
    %99 = arith.mulf %98, %96 : vector<8x16x128xf32>
    %100 = arith.addf %93, %99 : vector<8x16x128xf32>
    %101 = vector.extract_strided_slice %50 {offsets = [2, 1, 0], sizes = [1, 1, 128], strides = [1, 1, 1]} : vector<3x3x128xf32> to vector<1x1x128xf32>
    %102 = vector.shape_cast %101 : vector<1x1x128xf32> to vector<128xf32>
    %c2_50 = arith.constant 2 : index
    %c8_51 = arith.constant 8 : index
    %c0_52 = arith.constant 0 : index
    %103 = vector.load %arg10[%c2_50, %c8_51, %c0_52] : memref<10x32x128xf32, #tpu.memory_space<vmem>>, vector<8x16x128xf32>
    %104 = vector.shape_cast %102 : vector<128xf32> to vector<1x1x128xf32>
    %105 = vector.broadcast %104 : vector<1x1x128xf32> to vector<8x16x128xf32>
    %106 = arith.mulf %105, %103 : vector<8x16x128xf32>
    %107 = arith.addf %100, %106 : vector<8x16x128xf32>
    %108 = vector.extract_strided_slice %50 {offsets = [2, 2, 0], sizes = [1, 1, 128], strides = [1, 1, 1]} : vector<3x3x128xf32> to vector<1x1x128xf32>
    %109 = vector.shape_cast %108 : vector<1x1x128xf32> to vector<128xf32>
    %c2_53 = arith.constant 2 : index
    %c9_54 = arith.constant 9 : index
    %c0_55 = arith.constant 0 : index
    %110 = vector.load %arg10[%c2_53, %c9_54, %c0_55] : memref<10x32x128xf32, #tpu.memory_space<vmem>>, vector<8x16x128xf32>
    %111 = vector.shape_cast %109 : vector<128xf32> to vector<1x1x128xf32>
    %112 = vector.broadcast %111 : vector<1x1x128xf32> to vector<8x16x128xf32>
    %113 = arith.mulf %112, %110 : vector<8x16x128xf32>
    %114 = arith.addf %107, %113 : vector<8x16x128xf32>
    %c0_56 = arith.constant 0 : index
    %c0_57 = arith.constant 0 : index
    %c0_58 = arith.constant 0 : index
    %115 = vector.load %arg6[%c0_56, %c0_57, %c0_58] : memref<1x1x128xf32, #tpu.memory_space<vmem>>, vector<1x1x128xf32>
    %116 = vector.broadcast %115 : vector<1x1x128xf32> to vector<8x16x128xf32>
    %117 = arith.addf %114, %116 : vector<8x16x128xf32>
    %cst_59 = arith.constant 5.000000e-01 : f32
    %118 = vector.broadcast %cst_59 : f32 to vector<8x16x128xf32>
    %119 = arith.mulf %118, %117 : vector<8x16x128xf32>
    %cst_60 = arith.constant 0.707106769 : f32
    %120 = vector.broadcast %cst_60 : f32 to vector<8x16x128xf32>
    %121 = arith.mulf %117, %120 : vector<8x16x128xf32>
    %122 = math.erf %121 : vector<8x16x128xf32>
    %cst_61 = arith.constant 1.000000e+00 : f32
    %123 = vector.broadcast %cst_61 : f32 to vector<8x16x128xf32>
    %124 = arith.addf %123, %122 : vector<8x16x128xf32>
    %125 = arith.mulf %119, %124 : vector<8x16x128xf32>
    %126 = vector.shape_cast %125 : vector<8x16x128xf32> to vector<128x128xf32>
    %127 = arith.truncf %126 : vector<128x128xf32> to vector<128x128xbf16>
    %c0_62 = arith.constant 0 : index
    %c0_63 = arith.constant 0 : index
    %128 = vector.load %arg7[%c0_62, %c0_63] : memref<128x128xbf16, #tpu.memory_space<vmem>>, vector<128x128xbf16>
    %cst_64 = arith.constant dense<0.000000e+00> : vector<128x128xf32>
    %129 = tpu.matmul %127, %128, %cst_64 {dimension_numbers = #tpu.dot_dimension_numbers<[1], [0], [0], [1], [0, 0, 1, 1], [], []>} : vector<128x128xbf16>, vector<128x128xbf16>, vector<128x128xf32> -> vector<128x128xf32>
    %c0_65 = arith.constant 0 : index
    %c0_66 = arith.constant 0 : index
    %130 = vector.load %arg8[%c0_65, %c0_66] : memref<1x128xf32, #tpu.memory_space<vmem>>, vector<1x128xf32>
    %131 = vector.broadcast %130 : vector<1x128xf32> to vector<128x128xf32>
    %132 = arith.addf %129, %131 : vector<128x128xf32>
    %c0_67 = arith.constant 0 : index
    %c0_68 = arith.constant 0 : index
    %c0_69 = arith.constant 0 : index
    %133 = vector.load %arg9[%c0_67, %c0_68, %c0_69] : memref<1x128x128xf32, #tpu.memory_space<vmem>>, vector<1x128x128xf32>
    %134 = vector.shape_cast %133 : vector<1x128x128xf32> to vector<128x128xf32>
    %135 = vector.shape_cast %132 : vector<128x128xf32> to vector<1x128x128xf32>
    tpu.vector_store %arg9[%c0_67, %c0_68, %c0_69], %135 {strides = array<i32>} : memref<1x128x128xf32, #tpu.memory_space<vmem>>, vector<1x128x128xf32>,
    return
  }
  func.func @transform_0(%arg0: i32, %arg1: i32) -> (i32, i32, i32) {
    %c0_i32 = arith.constant 0 : i32
    %c0_i32_0 = arith.constant 0 : i32
    %c0_i32_1 = arith.constant 0 : i32
    return %arg0, %c0_i32, %c0_i32_0 : i32, i32, i32
  }
  func.func @transform_1(%arg0: i32, %arg1: i32) -> (i32, i32) {
    %c0_i32 = arith.constant 0 : i32
    %c0_i32_0 = arith.constant 0 : i32
    %c0_i32_1 = arith.constant 0 : i32
    return %c0_i32, %c0_i32_0 : i32, i32
  }
  func.func @transform_2(%arg0: i32, %arg1: i32) -> (i32, i32) {
    %c0_i32 = arith.constant 0 : i32
    %c0_i32_0 = arith.constant 0 : i32
    %c0_i32_1 = arith.constant 0 : i32
    return %c0_i32, %c0_i32_0 : i32, i32
  }
  func.func @transform_3(%arg0: i32, %arg1: i32) -> (i32, i32, i32) {
    %c0_i32 = arith.constant 0 : i32
    %c0_i32_0 = arith.constant 0 : i32
    %c0_i32_1 = arith.constant 0 : i32
    %c0_i32_2 = arith.constant 0 : i32
    return %c0_i32, %c0_i32_0, %c0_i32_1 : i32, i32, i32
  }
  func.func @transform_4(%arg0: i32, %arg1: i32) -> (i32, i32, i32) {
    %c0_i32 = arith.constant 0 : i32
    %c0_i32_0 = arith.constant 0 : i32
    %c0_i32_1 = arith.constant 0 : i32
    %c0_i32_2 = arith.constant 0 : i32
    return %c0_i32, %c0_i32_0, %c0_i32_1 : i32, i32, i32
  }
  func.func @transform_5(%arg0: i32, %arg1: i32) -> (i32, i32) {
    %c0_i32 = arith.constant 0 : i32
    %c0_i32_0 = arith.constant 0 : i32
    %c0_i32_1 = arith.constant 0 : i32
    return %c0_i32, %c0_i32_0 : i32, i32
  }
  func.func @transform_6(%arg0: i32, %arg1: i32) -> (i32, i32) {
    %c0_i32 = arith.constant 0 : i32
    %c0_i32_0 = arith.constant 0 : i32
    %c0_i32_1 = arith.constant 0 : i32
    return %c0_i32, %c0_i32_0 : i32, i32
  }
  func.func @transform_7(%arg0: i32, %arg1: i32) -> (i32, i32, i32) {
    %c0_i32 = arith.constant 0 : i32
    %c0_i32_0 = arith.constant 0 : i32
    return %arg0, %arg1, %c0_i32 : i32, i32, i32
  }
}

</mosaic_0001>

<bundles_post_ra>
// kernel: tpu_custom_call.1
= control target key start
LH: loop header
LB: loop body
LE: loop exit
PB: predicated region body
PF: predicated region fallthrough
CT: control target
= control target key end

     0   :  { %s3171_s0 = inlined_call_operand.hbm [shape: bf16[2,384,128], index: 0, kind: input, shape index: {}]   ;;  %s3172_s1 = inlined_call_operand.hbm [shape: bf16[128,128], index: 1, kind: input, shape index: {}]   ;;  %s3173_s2 = inlined_call_operand.vmem [shape: f32[1,128], index: 2, kind: input, shape index: {}]   ;;  %s3174_s3 = inlined_call_operand.hbm [shape: f32[3,3,128], index: 3, kind: input, shape index: {}]   ;;  %s3175_s4 = inlined_call_operand.vmem [shape: f32[1,1,128], index: 4, kind: input, shape index: {}]   ;;  %s3176_s5 = inlined_call_operand.hbm [shape: bf16[128,128], index: 5, kind: input, shape index: {}]   ;;  %s3177_s6 = inlined_call_operand.vmem [shape: f32[1,128], index: 6, kind: input, shape index: {}]   ;;  %s3178_s7 = inlined_call_operand.hbm [shape: f32[2,384,128], index: 7, kind: output, shape index: {}]  }
   0x1   :  { %3190 = sst [smem:[#allocation23_spill]] %s3172_s1 }
   0x2   :  { %3191 = sst [smem:[#allocation24_spill]] %s3174_s3 }
   0x3   :  { %3192 = sst [smem:[#allocation25_spill]] %s3176_s5 }
   0x4   :  { %3193 = sst [smem:[#allocation26_spill]] %s3178_s7 }
   0x5   :  { %12 = vsyncpa [#allocation4], 0 }
   0x6   :  { %14 = vsyncpa [#allocation4 + $0x1], 0 }
   0x7   :  { %15 = vsyncpa [#allocation7], 0 }
   0x8   :  { %16 = vsyncpa [#allocation10], 0 }
   0x9   :  { %17 = vsyncpa [#allocation5], 0 }
   0xa   :  { %19 = vsyncpa [#allocation5 + $0x1], 0  ;;  %s2365_s24 = smov 0   ;;  %s2367_s25 = smov 0  }
   0xb   :  { %s2369_s26 = smov 0   ;;  %s2371_s27 = smov 0  }
   0xc   :  { %s2373_s28 = smov 0   ;;  %s2375_s29 = smov 0  }
   0xd   :  { %s2377_s30 = smov 0   ;;  %s2379_s8 = smov 0  }
   0xe   :  { %s2381_s9 = smov 0   ;;  %s2383_s10 = smov 0  }
   0xf   :  { %s2385_s11 = smov 0  }
  0x10 LB: > { %3194 = sst [smem:[#allocation16_spill]] %s2272_s24  ;;  %s1668_s12 = sadd.s32 4294967295, %s2312_s11   ;;  %s2312_s11 = sphi %s2385_s11, %s25_s11   ;;  %s2308_s10 = sphi %s2383_s10, %s3233_s10   ;;  %s2304_s9 = sphi %s2381_s9, %s3224_s9   ;;  %s2300_s8 = sphi %s2379_s8, %s3232_s8   ;;  %s2296_s30 = sphi %s2377_s30, %s3223_s30   ;;  %s2292_s29 = sphi %s2375_s29, %s3231_s29   ;;  %s2288_s28 = sphi %s2373_s28, %s3230_s28   ;;  %s2284_s27 = sphi %s2371_s27, %s3229_s27   ;;  %s2280_s26 = sphi %s2369_s26, %s3228_s26   ;;  %s2276_s25 = sphi %s2367_s25, %s3227_s25   ;;  %s2272_s24 = sphi %s2365_s24, %s3226_s24  }
  0x11   : > { %3195 = sst [smem:[#allocation17_spill]] %s2300_s8  ;;  %s1669_s13 = sadd.s32 4294967294, %s2312_s11  }
  0x12   : > { %3196 = sst [smem:[#allocation18_spill]] %s2304_s9  ;;  %p57_p0 = scmp.ne.s32.totalorder %s2288_s28, %s2284_s27 }
  0x13   : > { %p2421_p1 = scmp.eq.s32.totalorder %s1668_s12, 0  ;;  %p208_p2 = scmp.ne.s32.totalorder %s2280_s26, %s2276_s25 }
  0x14   : > { %p209_p4 = scmp.eq.s32.totalorder %s1668_s12, 5  ;;  %p214_p5 = scmp.ne.s32.totalorder %s2276_s25, %s2272_s24 }
  0x15   : > { %p2430_p3 = por %p2421_p1, %p57_p0  ;;  %p215_p6 = scmp.eq.s32.totalorder %s1669_s13, 5 }
  0x16   : > { %p2436_p7 = por %p209_p4, %p208_p2  ;;  %p1670_p8 = scmp.ge.s32.totalorder %s2312_s11, 1 }
  0x17   : > { %p2441_p9 = por %p215_p6, %p214_p5  ;;  %p222_p10 = scmp.lt.s32.totalorder %s2312_s11, 7 }
  0x18   : > { %s3199_s17 = scalar_select %p2436_p7, 1, 0 }
  0x19   : > { %s3201_s18 = scalar_select %p2441_p9, 1, 0 }
  0x1a   : > { %3200 = sst [smem:[#allocation19_spill]] %s3199_s17  ;;  %p2446_p11 = pnand %p1670_p8, %p222_p10 }
  0x1b   : > { %3202 = sst [smem:[#allocation20_spill]] %s3201_s18  ;;  %s2314_s20 = smov [#allocation6]  }
  0x1c   : > { %s234_s21 = sshll.u32 %s2314_s20, 4  ;;  %p1897_p12 = pneg %p2446_p11  ;;  %s235_s21 = int_to_ptr.vmem [resolvable:$true] %s234_s21 }
  0x1d   : > { %s2315_s23 = smov [#allocation8]   ;;  %s2316_s12 = smov [#allocation9]  }
  0x1e   : > { %p2454_p13 = pnand %p1897_p12, %p2421_p1  ;;  %s250_s27 = sshll.u32 %s2315_s23, 4  ;;  %s251_s27 = int_to_ptr.vmem [resolvable:$true] %s250_s27 }
  0x1f   : > { %s266_s13 = sshll.u32 %s2316_s12, 4  ;;  %s2089_s15 = scalar_lea.vmem %s235_s21, 1024  ;;  %s267_s13 = int_to_ptr.vmem [resolvable:$true] %s266_s13 }
  0x20   : > { %p2080_p0 = pneg %p2454_p13  ;;  %p2090_p2 = scmp.ne.s32.totalorder %s235_s21, %s2089_s15 }
  0x21   : > { %p2097_p6 = scmp.lt.s32.totalorder %s235_s21, %s235_s21  ;;  %p2098_p8 = scmp.lt.s32.totalorder %s2089_s15, %s2089_s15 }
  0x22   : > { %p2092_p4 = pnand %p2090_p2, %p2080_p0 }
  0x23   : > { %p2099_p10 = por %p2098_p8, %p2097_p6 }
  0x24   : > { %p2093_p5 = pneg %p2092_p4 }
  0x26   : > { %p2100_p12 = pnand %p2099_p10, %p2093_p5 }
  0x28   : > { %2103 = shalt.err (!%p2100_p12)
}
  0x29   : > { %s3182_s20 = smov 64   ;;  %s3183_s23 = smov 4  }
  0x2a   : > { %s3205_s1 = sld [smem:[#allocation23_spill]]  ;;  %s2115_s24 = scalar_lea.vmem %s251_s27, 192 }
  0x2b   : > { %p2116_p2 = scmp.ne.s32.totalorder %s251_s27, %s2115_s24  ;;  %p2123_p5 = scmp.lt.s32.totalorder %s251_s27, %s251_s27 }
  0x2c   : > { %p2124_p8 = scmp.lt.s32.totalorder %s2115_s24, %s2115_s24 }
  0x2d   : > { %p2118_p4 = pnand %p2116_p2, %p2080_p0 }
  0x2e   : > { %p2125_p10 = por %p2124_p8, %p2123_p5 }
  0x2f   : > { %p2119_p6 = pneg %p2118_p4 }
  0x30   : > { %1900 = dma.hbm_to_vmem [thread:$0]  (!%p2454_p13), %s3205_s1, 1024, %s235_s21, [#allocation7], %s3182_s20, %s3182_s20, %s3183_s23  }
  0x31   : > { %p2126_p12 = pnand %p2125_p10, %p2119_p6 }
  0x33   : > { %2129 = shalt.err (!%p2126_p12)
}
  0x34   : > { %s3206_s3 = sld [smem:[#allocation24_spill]]  ;;  %s2141_s18 = scalar_lea.vmem %s267_s13, 1024 }
  0x35   : > { %p2142_p9 = scmp.ne.s32.totalorder %s267_s13, %s2141_s18  ;;  %p2149_p5 = scmp.lt.s32.totalorder %s267_s13, %s267_s13 }
  0x36   : > { %p2150_p6 = scmp.lt.s32.totalorder %s2141_s18, %s2141_s18 }
  0x37   : > { %p2144_p2 = pnand %p2142_p9, %p2080_p0 }
  0x38   : > { %p2151_p8 = por %p2150_p6, %p2149_p5 }
  0x39   : > { %p2145_p4 = pneg %p2144_p2 }
  0x3a   : > { %1903 = dma.hbm_to_vmem [thread:$0]  (!%p2454_p13), %s3206_s3, 192, %s251_s27, [#allocation7], %s3182_s20, %s3182_s20, %s3183_s23  }
  0x3b   : > { %p2152_p10 = pnand %p2151_p8, %p2145_p4 }
  0x3d   : > { %2155 = shalt.err (!%p2152_p10)
}
  0x3e   : > { %s3207_s5 = sld [smem:[#allocation25_spill]]  ;;  %s34_s21 = sadd.s32 1, %s2304_s9 }
  0x3f   : > { %p35_p9 = scmp.ge.s32.totalorder %s34_s21, 3  ;;  %s37_s22 = sadd.s32 1, %s2308_s10 }
  0x40   : > { %s44_s27 = sadd.s32 1, %s2292_s29  ;;  %p51_p0 = scmp.ne.s32.totalorder %s2292_s29, %s2288_s28 }
  0x41   : > { %s3235_s21 = smov (%p35_p9, %s34_s21), 0  ;;  %s3237_s22 = smov (!%p35_p9, %s37_s22), %s2308_s10 }
  0x42   : > { %3208 = sst [smem:[#allocation21_spill]] %s3235_s21  ;;  %p52_p12 = scmp.eq.s32.totalorder %s2312_s11, 0 }
  0x43   : > { %s194_s12 = ssub.s32 %s2304_s9, %s3235_s21  ;;  %p39_p2 = scmp.ge.s32.totalorder %s3237_s22, 2 }
  0x44   : > { %1906 = dma.hbm_to_vmem [thread:$0]  (!%p2454_p13), %s3207_s5, 1024, %s267_s13, [#allocation10], %s3182_s20, %s3182_s20, %s3183_s23  }
  0x45   : > { %p1918_p4 = scmp.lt.s32.totalorder %s2312_s11, 6  ;;  %p2505_p13 = por %p52_p12, %p51_p0 }
  0x46   : > { %s283_s15 = sand.u32 1, %s2292_s29   ;;  %s3239_s22 = smov (%p39_p2, %s3237_s22), 0 }
  0x47   : > { %3210 = sst [smem:[#allocation22_spill]] %s3239_s22  ;;  %s1877_s18 = smul.u32 192, %s283_s15 }
  0x48   : > { %s41_s7 = ssub.s32 %s2308_s10, %s3239_s22  ;;  %s1878_s24 = smul.u32 3072, %s2308_s10 }
  0x49   : > { %p42_p5 = scmp.eq.s32.totalorder %s41_s7, 0  ;;  %s195_s20 = sor.u32 %s194_s12, %s41_s7 }
  0x4a   : > { %p196_p6 = scmp.eq.s32.totalorder %s195_s20, 0  ;;  %s3211_s1 = sadd.s32 1, %s2280_s26 }
  0x4b   : > { %s2516_s23 = scalar_select %p42_p5, %s2292_s29, %s44_s27  }
  0x4c   : > { %s2521_s3 = scalar_select %p196_p6, %s2280_s26, %s3211_s1  }
  0x4d   : > { %s293_s9 = scalar_lea.hbm %s3171_s0, %s1878_s24  ;;  %s287_s17 = scalar_lea.vmem [#allocation3], %s1877_s18 }
  0x4e   : > { %s294_s8 = sshll.u32 %s287_s17, 4  ;;  %p2530_p8 = pnand %p1918_p4, %p2505_p13  ;;  %s295_s8 = int_to_ptr.vmem [resolvable:$true] %s294_s8 }
  0x4f   : > { %s284_s20 = scalar_lea.sflag [#allocation4], %s283_s15  ;;  %s2169_s27 = scalar_lea.vmem %s295_s8, 3072 }
  0x50   : > { %p2158_p10 = pneg %p2530_p8  ;;  %p2170_p9 = scmp.ne.s32.totalorder %s295_s8, %s2169_s27 }
  0x51   : > { %s2319_s1 = smov [#allocation3]  }
  0x52   : > { %p2172_p0 = pnand %p2170_p9, %p2158_p10  ;;  %s2174_s5 = sshll.u32 %s2319_s1, 4  ;;  %s2175_s5 = int_to_ptr.vmem [resolvable:$false] %s2174_s5 }
  0x53   : > { %s2176_s21 = scalar_lea.vmem %s2175_s5, 6144  ;;  %p2177_p2 = scmp.lt.s32.totalorder %s295_s8, %s2175_s5 }
  0x54   : > { %p2173_p12 = pneg %p2172_p0  ;;  %p2178_p5 = scmp.lt.s32.totalorder %s2176_s21, %s2169_s27 }
  0x56   : > { %p2179_p6 = por %p2178_p5, %p2177_p2 }
  0x58   : > { %p2180_p7 = pnand %p2179_p6, %p2173_p12 }
  0x5a   : > { %2183 = shalt.err (!%p2180_p7)
}
  0x5b   : > { %s3213_s17 = smov 4   ;;  %s3214_s12 = smov 64  }
  0x5c   : > { %1910 = dma.hbm_to_vmem [thread:$0]  (!%p2530_p8), %s293_s9, 3072, %s295_s8, %s284_s20, %s3214_s12, %s3214_s12, %s3213_s17  }
  0x5d   : > { %306 = sbr.rel (%p2446_p11) target bundleno = 677 (0x2a5), region = 48  ;;  %s308_s13 = sand.u32 (!%p2446_p11), 1, %s2288_s28  }
  0x5e   : > { %s1879_s15 = smul.u32 (!%p2446_p11), 192, %s308_s13  ;;  %s309_s18 = scalar_lea.sflag (!%p2446_p11), [#allocation4], %s308_s13 }
  0x60   : > { %s2544_s7 = scalar_lea.vmem (!%p2446_p11), [#allocation3], %s1879_s15 }
  0x62   : > { %2255 = dma.done.wait (%p2430_p3), %s309_s18, 3072  }
  0x63   : > { %2257 = vsyncadd (%p2430_p3), %s309_s18, 4294964224 }
  0x64   : > { %2259 = dma.done.wait (%p2421_p1), [#allocation7], 1216  }
  0x65   : > { %2261 = vsyncadd (%p2421_p1), [#allocation7], 4294966080 }
  0x66   : > { %2263 = dma.done.wait (%p2421_p1), [#allocation10], 1024  }
  0x67   : > { %2265 = vsyncadd (%p2421_p1), [#allocation10], 4294966272  ;;  %s1681_s8 = sshll.u32 %s2296_s30, 3  ;;  %v2320_v0 = vmov 0.0   ;;  %vm2321_vm0 = vmmov 0   ;;  %s1682_s14 = sshll.u32 %s2296_s30, 7  ;;  %v782_v27 = vlaneseq }
  0x68   : > { %1805 = vmatprep.subr.bf16.mxu1 %v2320_v0  ;;  %743 = vst [vmem:[#allocation2 + $0x7] sm:$0x1] %v2320_v0  ;;  %744 = vst [vmem:[#allocation2 + $0x27] sm:$0x1] %v2320_v0  ;;  %1821 = vmatprep.mubr.msk.bf16.mxu1 %vm2321_vm0, %v2320_v0  ;;  %s1701_s9 = sadd.s32 4294967295, %s1681_s8  ;;  %s598_s16 = sadd.s32 8, %s1681_s8 }
  0x69   : > { %745 = vst [vmem:[#allocation2 + $0x47] sm:$0x1] %v2320_v0  ;;  %746 = vst [vmem:[#allocation2 + $0x67] sm:$0x1] %v2320_v0  ;;  %p596_p1 = scmp.gt.s32.totalorder %s1701_s9, 0  ;;  %s376_s19 = sshra.s32 %s1682_s14, 3 }
  0x6a   : > { %747 = vst [vmem:[#allocation2 + $0x87] sm:$0x1] %v2320_v0  ;;  %748 = vst [vmem:[#allocation2 + $0xa7] sm:$0x1] %v2320_v0  ;;  %p599_p3 = scmp.lt.s32.totalorder %s598_s16, 23  ;;  %v2020_v1 = vld [vmem:[#allocation6 + $0x38] sm:$0xff]  }
  0x6b   : > { %749 = vst [vmem:[#allocation2 + $0xc7] sm:$0x1] %v2320_v0  ;;  %750 = vst [vmem:[#allocation2 + $0xe7] sm:$0x1] %v2320_v0  ;;  %s3241_s9 = smov (!%p596_p1, %s1701_s9), 0  ;;  %v2021_v2 = vld [vmem:[#allocation6 + $0x30] sm:$0xff]   ;;  %1773 = vmatprep.subr.bf16.mxu0 %v2020_v1  ;;  %1806 = vmatpush3.bf16.msra.mxu1 %v2020_v1 }
  0x6c   : > { %751 = vst [vmem:[#allocation2 + $0x107] sm:$0x1] %v2320_v0  ;;  %752 = vst [vmem:[#allocation2 + $0x127] sm:$0x1] %v2320_v0  ;;  %s1702_s22 = sshll.u32 %s3241_s9, 4  ;;  %s1683_s24 = sshll.u32 %s376_s19, 2  ;;  %1774 = vmatpush3.bf16.msra.mxu0 %v2020_v1  ;;  %1807 = vmatprep.subr.bf16.mxu1 %v2320_v0 }
  0x6d   : > { %753 = vst [vmem:[#allocation2 + $0x18] sm:$0x1] %v2320_v0  ;;  %754 = vst [vmem:[#allocation2 + $0x38] sm:$0x1] %v2320_v0  ;;  %s602_s20 = sshra.s32 %s1702_s22, 3  ;;  %s3243_s16 = smov (!%p599_p3, %s598_s16), 23  ;;  %1775 = vmatprep.subr.bf16.mxu0 %v2021_v2 }
  0x6e   : > { %755 = vst [vmem:[#allocation2 + $0x58] sm:$0x1] %v2320_v0  ;;  %756 = vst [vmem:[#allocation2 + $0x78] sm:$0x1] %v2320_v0  ;;  %v2022_v3 = vld [vmem:[#allocation6 + $0x28] sm:$0xff]   ;;  %s2585_s27 = scalar_lea.vmem %s2544_s7, %s1683_s24 [#allocation3]  ;;  %s1703_s1 = sshll.u32 %s602_s20, 2 }
  0x6f   : > { %757 = vst [vmem:[#allocation2 + $0x98] sm:$0x1] %v2320_v0  ;;  %758 = vst [vmem:[#allocation2 + $0xb8] sm:$0x1] %v2320_v0  ;;  %1808 = vmatpush3.bf16.msra.mxu1 %v2021_v2  ;;  %v2023_v4 = vld [vmem:[#allocation6 + $0x20] sm:$0xff]   ;;  %s1704_s5 = sshll.u32 %s3243_s16, 4  ;;  %s605_s21 = scalar_lea.vmem %s2544_s7, %s1703_s1 [#allocation3] }
  0x70   : > { %759 = vst [vmem:[#allocation2 + $0xd8] sm:$0x1] %v2320_v0  ;;  %760 = vst [vmem:[#allocation2 + $0xf8] sm:$0x1] %v2320_v0  ;;  %1776 = vmatpush3.bf16.msra.mxu0 %v2021_v2  ;;  %1809 = vmatprep.subr.bf16.mxu1 %v2320_v0  ;;  %v2028_v5 = vld [vmem:[%s2585_s27] sm:$0xff]   ;;  %s609_s17 = sshra.s32 %s1704_s5, 3 }
  0x71   : > { %761 = vst [vmem:[#allocation2 + $0x118] sm:$0x1] %v2320_v0  ;;  %762 = vst [vmem:[#allocation2 + $0x138] sm:$0x1] %v2320_v0  ;;  %1777 = vmatprep.subr.bf16.mxu0 %v2022_v3  ;;  %1789 = vmatprep.mubr.bf16.mxu0 %v2028_v5  ;;  %v2024_v6 = vld [vmem:[#allocation6 + $0x18] sm:$0xff]   ;;  %s1705_s12 = sshll.u32 %s609_s17, 2 }
  0x72   : > { %v2025_v7 = vld [vmem:[#allocation6 + $0x10] sm:$0xff]   ;;  %s2593_s13 = scalar_lea.vmem %s2544_s7, %s1705_s12 [#allocation3]  ;;  %v2026_v8 = vld [vmem:[#allocation6 + $0x8] sm:$0xff]   ;;  %v2027_v9 = vld [vmem:[#allocation6] sm:$0xff]   ;;  %p709_p7 = scmp.gt.s32.totalorder %s2296_s30, 0  ;;  %v783_v28 = vshrl.u32 %v782_v27, 7 }
  0x73   : > { %1810 = vmatpush3.bf16.msra.mxu1 %v2022_v3  ;;  %v2029_v10 = vld [vmem:[%s605_s21] sm:$0xff]   ;;  %v2030_v11 = vld [vmem:[%s2585_s27 + $0x8] sm:$0xff]   ;;  %v2031_v12 = vld [vmem:[%s2585_s27 + $0x10] sm:$0xff]   ;;  %p715_p11 = scmp.lt.s32.totalorder %s2296_s30, 2  ;;  %s352_s22 = sand.u32 1, %s2276_s25  }
  0x74   : > { %1778 = vmatpush3.bf16.msra.mxu0 %v2022_v3  ;;  %1811 = vmatprep.subr.bf16.mxu1 %v2320_v0  ;;  %v2032_v13 = vld [vmem:[%s2585_s27 + $0x18] sm:$0xff]   ;;  %v2033_v14 = vld [vmem:[%s2585_s27 + $0x20] sm:$0xff]   ;;  %v2034_v15 = vld [vmem:[%s2585_s27 + $0x28] sm:$0xff]   ;;  %s710_s15 = scalar_select %p709_p7, 1, 0  ;;  %v836_v34 = vsub.s32 1, %v783_v28 }
  0x75   : > { %1779 = vmatprep.subr.bf16.mxu0 %v2023_v4  ;;  %v2035_v16 = vld [vmem:[%s2585_s27 + $0x30] sm:$0xff]   ;;  %v2036_v17 = vld [vmem:[%s2585_s27 + $0x38] sm:$0xff]   ;;  %v2037_v18 = vld [vmem:[%s2593_s13] sm:$0xff]   ;;  %s2624_s9 = scalar_select %p715_p11, 1, 0  ;;  %v784_v42 = vsub.s32 0, %v783_v28 }
  0x76   : > { %v2038_v19 = vld [vmem:[#allocation9 + $0x38] sm:$0xff]   ;;  %v2039_v20 = vld [vmem:[#allocation9 + $0x30] sm:$0xff]   ;;  %v2040_v21 = vld [vmem:[#allocation9 + $0x28] sm:$0xff]   ;;  %s711_s18 = scvt.s32.f32 %s710_s15  ;;  %v888_v45 = vsub.s32 2, %v783_v28  ;;  %s1680_s24 = sshll.u32 %s352_s22, 7 }
  0x77   : > { %1812 = vmatpush3.bf16.msra.mxu1 %v2023_v4  ;;  %v2041_v22 = vld [vmem:[#allocation9 + $0x20] sm:$0xff]   ;;  %v2042_v23 = vld [vmem:[#allocation9 + $0x18] sm:$0xff]   ;;  %v2043_v24 = vld [vmem:[#allocation9 + $0x10] sm:$0xff]   ;;  %s717_s14 = scvt.s32.f32 %s2624_s9  ;;  %s3081_s1 = scalar_lea.vmem [#allocation11], %s1680_s24 }
  0x78   : > { %1780 = vmatpush3.bf16.msra.mxu0 %v2023_v4  ;;  %1813 = vmatprep.subr.bf16.mxu1 %v2320_v0  ;;  %v2044_v25 = vld [vmem:[#allocation9 + $0x8] sm:$0xff]   ;;  %v2045_v26 = vld [vmem:[#allocation9] sm:$0xff]   ;;  %v2621_v29 = vld [vmem:[%s3173_s2] ss:$0 sm:$0xff]  ;;  %v712_v31 = vstv %s711_s18  ;;  %s3215_s5 = sld [smem:[#allocation17_spill]]  ;;  %s1719_s17 = sshll.u32 %s2296_s30, 4 }
  0x79   : > { %1781 = vmatprep.subr.bf16.mxu0 %v2024_v6  ;;  %v763_v37 = vld [vmem:[#allocation8] sm:$0x7]  ;;  %v764_v38 = vld [vmem:[#allocation8 + $0x4] sm:$0x7]  ;;  %v765_v39 = vld [vmem:[#allocation8 + $0x8] sm:$0x7]  ;;  %v2650_v63 = vstv %s717_s14 }
  0x7a   : > { %v2630_v48 = vrot.slane %v763_v37, %v836_v34  ;;  %v2632_v49 = vrot.slane %v764_v38, %v836_v34  ;;  %v2634_v50 = vrot.slane %v765_v39, %v836_v34  ;;  %v2637_v55 = vrot.slane %v763_v37, %v784_v42  ;;  %s3216_s13 = sld [smem:[#allocation19_spill]]  ;;  %s1546_s15 = sshll.u32 %s3081_s1, 4  ;;  %s3100_s15 = int_to_ptr.vmem [resolvable:$true] %s1546_s15 }
  0x7b   : > { %1814 = vmatpush3.bf16.msra.mxu1 %v2024_v6  ;;  %v2639_v56 = vrot.slane %v764_v38, %v784_v42  ;;  %v2641_v57 = vrot.slane %v765_v39, %v784_v42  ;;  %v2644_v59 = vrot.slane %v763_v37, %v888_v45  ;;  %v2646_v60 = vrot.slane %v764_v38, %v888_v45  ;;  %s3217_s8 = sld [smem:[#allocation26_spill]]  ;;  %s3111_s16 = scalar_lea.sflag [#allocation5], %s352_s22 }
  0x7c   : > { %1782 = vmatpush3.bf16.msra.mxu0 %v2024_v6  ;;  %1815 = vmatprep.subr.bf16.mxu1 %v2320_v0  ;;  %v2648_v61 = vrot.slane %v765_v39, %v888_v45  ;;  %s2184_s19 = scalar_lea.vmem %s3100_s15, 2048  ;;  %s2322_s24 = smov [#allocation11]  }
  0x7d   : > { %1783 = vmatprep.subr.bf16.mxu0 %v2025_v7  ;;  %p2185_p4 = scmp.ne.s32.totalorder %s3100_s15, %s2184_s19  ;;  %s2188_s20 = sshll.u32 %s2322_s24, 4  ;;  %s2189_s20 = int_to_ptr.vmem [resolvable:$false] %s2188_s20 }
  0x7e   : > { %s1880_s21 = smul.u32 48, %s3215_s5  ;;  %s2190_s27 = scalar_lea.vmem %s2189_s20, 4096 }
  0x7f   : > { %1816 = vmatpush3.bf16.msra.mxu1 %v2025_v7  ;;  %p2191_p9 = scmp.lt.s32.totalorder %s3100_s15, %s2189_s20  ;;  %p2192_p0 = scmp.lt.s32.totalorder %s2190_s27, %s2184_s19 }
  0x80   : > { %1784 = vmatpush3.bf16.msra.mxu0 %v2025_v7  ;;  %1817 = vmatprep.subr.bf16.mxu1 %v2320_v0  ;;  %s1543_s12 = sadd.s32 %s1880_s21, %s1719_s17  ;;  %p3219_p13 = scmp.ne.s32.totalorder %s3216_s13, 0 }
  0x81   : > { %1785 = vmatprep.subr.bf16.mxu0 %v2026_v8  ;;  %s1720_s18 = sshll.u32 %s1543_s12, 7  ;;  %s3218_s14 = smov %s3217_s8 }
  0x82   : > { %s3106_s9 = scalar_lea.hbm %s3217_s8, %s1720_s18  ;;  %p2186_p8 = pnand %p2185_p4, %p3219_p13 }
  0x83   : > { %1818 = vmatpush3.bf16.msra.mxu1 %v2026_v8  ;;  %p2193_p12 = por %p2192_p0, %p2191_p9 }
  0x84   : > { %1786 = vmatpush3.bf16.msra.mxu0 %v2026_v8  ;;  %1819 = vmatprep.subr.bf16.mxu1 %v2320_v0  ;;  %p2187_p10 = pneg %p2186_p8 }
  0x85   : > { %1787 = vmatprep.subr.bf16.mxu0 %v2027_v9 }
  0x86   : > { %p2194_p2 = pnand %p2193_p12, %p2187_p10 }
  0x87   : > { %1820 = vmatpush3.bf16.msra.mxu1 %v2027_v9 }
  0x88   : > { %1788 = vmatpush3.bf16.msra.mxu0 %v2027_v9  ;;  %1845 = vmatprep.subr.bf16.mxu1 %v2038_v19 }
  0x89   : > { %1825 = vmatprep.subr.bf16.mxu0 %v2320_v0 }
  0x8a   : > { %1822 = vmatmul.mubr.bf16.vlgmr.msra.gmra.mxu1 %v2029_v10 }
  0x8b   : > { %1790 = vmatmul.mubr.bf16.vlgmr.msra.gmra.mxu0 %v2030_v11  ;;  %1846 = vmatpush3.bf16.msra.mxu1 %v2038_v19 }
  0x8c   : > { %1826 = vmatpush3.bf16.msra.mxu0 %v2020_v1  ;;  %1793 = vmatprep.mubr.bf16.mxu0 %v2031_v12 }
  0x8d   : > { %1827 = vmatprep.subr.bf16.mxu0 %v2320_v0  ;;  %1847 = vmatprep.subr.bf16.mxu1 %v2039_v20 }
  0x8f   : > { %1848 = vmatpush3.bf16.msra.mxu1 %v2039_v20 }
  0x90   : > { %1828 = vmatpush3.bf16.msra.mxu0 %v2021_v2  ;;  %1849 = vmatprep.subr.bf16.mxu1 %v2040_v21 }
  0x91   : > { %1829 = vmatprep.subr.bf16.mxu0 %v2320_v0 }
  0x93   : > { %1794 = vmatmul.mubr.bf16.gmra.mxu0 %v2032_v13  ;;  %1850 = vmatpush3.bf16.msra.mxu1 %v2040_v21 }
  0x94   : > { %1830 = vmatpush3.bf16.msra.mxu0 %v2022_v3  ;;  %1797 = vmatprep.mubr.bf16.mxu0 %v2033_v14 }
  0x95   : > { %1831 = vmatprep.subr.bf16.mxu0 %v2320_v0  ;;  %1851 = vmatprep.subr.bf16.mxu1 %v2041_v22 }
  0x97   : > { %1852 = vmatpush3.bf16.msra.mxu1 %v2041_v22 }
  0x98   : > { %1832 = vmatpush3.bf16.msra.mxu0 %v2023_v4  ;;  %1853 = vmatprep.subr.bf16.mxu1 %v2042_v23 }
  0x99   : > { %1833 = vmatprep.subr.bf16.mxu0 %v2320_v0 }
  0x9b   : > { %1798 = vmatmul.mubr.bf16.gmra.mxu0 %v2034_v15  ;;  %1854 = vmatpush3.bf16.msra.mxu1 %v2042_v23 }
  0x9c   : > { %1834 = vmatpush3.bf16.msra.mxu0 %v2024_v6  ;;  %1801 = vmatprep.mubr.bf16.mxu0 %v2035_v16 }
  0x9d   : > { %1835 = vmatprep.subr.bf16.mxu0 %v2320_v0  ;;  %1855 = vmatprep.subr.bf16.mxu1 %v2043_v24 }
  0x9f   : > { %1856 = vmatpush3.bf16.msra.mxu1 %v2043_v24 }
  0xa0   : > { %1836 = vmatpush3.bf16.msra.mxu0 %v2025_v7  ;;  %1857 = vmatprep.subr.bf16.mxu1 %v2044_v25 }
  0xa1   : > { %1837 = vmatprep.subr.bf16.mxu0 %v2320_v0 }
  0xa3   : > { %1802 = vmatmul.mubr.bf16.gmra.mxu0 %v2036_v17  ;;  %1858 = vmatpush3.bf16.msra.mxu1 %v2044_v25 }
  0xa4   : > { %1838 = vmatpush3.bf16.msra.mxu0 %v2026_v8  ;;  %1841 = vmatprep.mubr.msk.bf16.mxu0 %vm2321_vm0, %v2320_v0 }
  0xa5   : > { %1839 = vmatprep.subr.bf16.mxu0 %v2320_v0  ;;  %1859 = vmatprep.subr.bf16.mxu1 %v2045_v26 }
  0xa7   : > { %1860 = vmatpush3.bf16.msra.mxu1 %v2045_v26 }
  0xa8   : > { %1840 = vmatpush3.bf16.msra.mxu0 %v2027_v9 }
  0xab   : > { %1842 = vmatmul.mubr.bf16.vlgmr.msra.gmra.mxu0 %v2037_v18 }
 0x14a   : > { %v655_v30 = vpop.f32.mrf.mxu1 }
 0x14b   : > { %v656_v32 = vadd.f32 %v2621_v29, %v655_v30  ;;  %v1791_v33 = vpop.f32.mrf.mxu0 }
 0x14c   : > { %v541_v35 = vadd.f32 %v1791_v33, %v2621_v29  ;;  %v1823_v36 = vpop.f32.mrf.mxu1 }
 0x14d   : > { %v713_v40 = vmul.f32 %v712_v31, %v656_v32  ;;  %v532_v41 = vpop.f32.mrf.mxu0 }
 0x14e   : > { %726 = vst [vmem:[#allocation2 + $0x48] sm:$0xff] %v541_v35  ;;  %v533_v43 = vadd.f32 %v2621_v29, %v532_v41  ;;  %v658_v44 = vpop.f32.mrf.mxu1  ;;  %v2653_v0 = vmul.f32 %v2634_v50, %v541_v35  ;;  %v2656_v1 = vmul.f32 %v2632_v49, %v541_v35  ;;  %v842_v2 = vmul.f32 %v2630_v48, %v541_v35 }
 0x14f   : > { %721 = vst [vmem:[#allocation2 + $0x8] sm:$0xff] %v713_v40  ;;  %v659_v46 = vadd.f32 %v2621_v29, %v658_v44  ;;  %v1792_v47 = vpop.f32.mrf.mxu0  ;;  %v838_v4 = vmul.f32 %v2630_v48, %v713_v40 }
 0x150   : > { %724 = vst [vmem:[#allocation2 + $0x28] sm:$0xff] %v533_v43  ;;  %v544_v51 = vadd.f32 %v1792_v47, %v2621_v29  ;;  %v1824_v52 = vpop.f32.mrf.mxu1  ;;  %v2664_v5 = vmul.f32 %v2632_v49, %v533_v43  ;;  %v840_v6 = vmul.f32 %v2630_v48, %v533_v43 }
 0x151   : > { %v714_v53 = vmul.f32 %v712_v31, %v659_v46  ;;  %v535_v54 = vpop.f32.mrf.mxu0 }
 0x152   : > { %727 = vst [vmem:[#allocation2 + $0x50] sm:$0xff] %v544_v51  ;;  %v536_v58 = vadd.f32 %v2621_v29, %v535_v54  ;;  %v2669_v10 = vmul.f32 %v2634_v50, %v544_v51  ;;  %v2672_v11 = vmul.f32 %v2632_v49, %v544_v51  ;;  %v2675_v12 = vmul.f32 %v2630_v48, %v544_v51 }
 0x153   : > { %722 = vst [vmem:[#allocation2 + $0x10] sm:$0xff] %v714_v53  ;;  %v1795_v62 = vpop.f32.mrf.mxu0  ;;  %v839_v8 = vmul.f32 %v2630_v48, %v714_v53 }
 0x154   : > { %725 = vst [vmem:[#allocation2 + $0x30] sm:$0xff] %v536_v58  ;;  %v2660_v3 = vadd.f32 %v1795_v62, %v2621_v29  ;;  %v2682_v15 = vmul.f32 %v2632_v49, %v536_v58  ;;  %v841_v16 = vmul.f32 %v2630_v48, %v536_v58 }
 0x155   : > { %v548_v7 = vpop.f32.mrf.mxu0  ;;  %v1079_v9 = vld [vmem:[#allocation2 + $0x47] sm:$0xff] }
 0x156   : > { %730 = vst [vmem:[#allocation2 + $0x88] sm:$0xff] %v2660_v3  ;;  %v2679_v13 = vadd.f32 %v2621_v29, %v548_v7  ;;  %v766_v14 = vld [vmem:[#allocation2 + $0x7] sm:$0xff]  ;;  %v790_v17 = vmul.f32 %v1079_v9, %v2637_v55  ;;  %v2688_v21 = vmul.f32 %v2641_v57, %v1079_v9  ;;  %v944_v22 = vmul.f32 %v1079_v9, %v2639_v56 }
 0x157   : > { %v1796_v18 = vpop.f32.mrf.mxu0  ;;  %v786_v19 = vmul.f32 %v2637_v55, %v766_v14  ;;  %v922_v20 = vld [vmem:[#allocation2 + $0x27] sm:$0xff]  ;;  %v2693_v23 = vmul.f32 %v2634_v50, %v2660_v3  ;;  %v2703_v27 = vmul.f32 %v2632_v49, %v2660_v3 }
 0x158   : > { %728 = vst [vmem:[#allocation2 + $0x68] sm:$0xff] %v2679_v13  ;;  %v2697_v24 = vadd.f32 %v1796_v18, %v2621_v29  ;;  %v942_v25 = vmul.f32 %v2639_v56, %v922_v20  ;;  %v788_v26 = vmul.f32 %v922_v20, %v2637_v55  ;;  %v2707_v34 = vmul.f32 %v2634_v50, %v2679_v13 }
 0x159   : > { %v551_v28 = vpop.f32.mrf.mxu0  ;;  %v854_v30 = vadd.f32 %v838_v4, %v786_v19  ;;  %v1080_v31 = vld [vmem:[#allocation2 + $0x4f] sm:$0xff]  ;;  %v2709_v35 = vadd.f32 %v842_v2, %v790_v17  ;;  %v2713_v36 = vmul.f32 %v2632_v49, %v2679_v13 }
 0x15a   : > { %v1183_v32 = vld [vmem:[#allocation2 + $0x49] sm:$0xff]  ;;  %v1184_v33 = vld [vmem:[#allocation2 + $0x51] sm:$0xff]  ;;  %731 = vst [vmem:[#allocation2 + $0x90] sm:$0xff] %v2697_v24  ;;  %v2717_v37 = vadd.f32 %v2621_v29, %v551_v28  ;;  %v2720_v41 = vmul.f32 %v2641_v57, %v1080_v31  ;;  %v856_v54 = vadd.f32 %v840_v6, %v788_v26  ;;  %v945_v20 = vmul.f32 %v1080_v31, %v2639_v56 }
 0x15b   : > { %v767_v38 = vld [vmem:[#allocation2 + $0xf] sm:$0xff]  ;;  %v2723_v42 = vmul.f32 %v2648_v61, %v1183_v32  ;;  %v2726_v43 = vmul.f32 %v2648_v61, %v1184_v33  ;;  %v1799_v44 = vpop.f32.mrf.mxu0  ;;  %v1048_v26 = vmul.f32 %v1183_v32, %v2646_v60 }
 0x15c   : > { %v870_v39 = vld [vmem:[#allocation2 + $0x9] sm:$0xff]  ;;  %v871_v40 = vld [vmem:[#allocation2 + $0x11] sm:$0xff]  ;;  %v787_v45 = vmul.f32 %v2637_v55, %v767_v38  ;;  %729 = vst [vmem:[#allocation2 + $0x70] sm:$0xff] %v2717_v37  ;;  %v2733_v58 = vadd.f32 %v1799_v44, %v2621_v29 }
 0x15d   : > { %v890_v46 = vmul.f32 %v2644_v59, %v870_v39  ;;  %v891_v47 = vmul.f32 %v2644_v59, %v871_v40  ;;  %v923_v51 = vld [vmem:[#allocation2 + $0x2f] sm:$0xff]  ;;  %v564_v7 = vpop.f32.mrf.mxu0 }
 0x15e   : > { %v1026_v52 = vld [vmem:[#allocation2 + $0x29] sm:$0xff]  ;;  %v1027_v53 = vld [vmem:[#allocation2 + $0x31] sm:$0xff]  ;;  %v943_v62 = vmul.f32 %v2639_v56, %v923_v51  ;;  %v855_v9 = vadd.f32 %v839_v8, %v787_v45  ;;  %v789_v17 = vmul.f32 %v923_v51, %v2637_v55  ;;  %734 = vst [vmem:[#allocation2 + $0xc8] sm:$0xff] %v2733_v58  ;;  %v2742_v6 = vadd.f32 %v2621_v29, %v564_v7 }
 0x15f   : > { %v1046_v2 = vmul.f32 %v2646_v60, %v1026_v52  ;;  %v1047_v4 = vmul.f32 %v2646_v60, %v1027_v53  ;;  %v906_v14 = vadd.f32 %v890_v46, %v854_v30  ;;  %v892_v18 = vmul.f32 %v1026_v52, %v2644_v59  ;;  %v1800_v28 = vpop.f32.mrf.mxu0  ;;  %v2747_v40 = vld [vmem:[#allocation2 + $0x67] sm:$0xff] }
 0x160   : > { %v893_v19 = vmul.f32 %v1027_v53, %v2644_v59  ;;  %v907_v38 = vadd.f32 %v891_v47, %v855_v9  ;;  %v857_v8 = vadd.f32 %v841_v16, %v789_v17  ;;  %732 = vst [vmem:[#allocation2 + $0xa8] sm:$0xff] %v2742_v6  ;;  %v2751_v44 = vadd.f32 %v1800_v28, %v2621_v29 }
 0x161   : > { %v958_v39 = vadd.f32 %v942_v25, %v906_v14  ;;  %v908_v30 = vadd.f32 %v892_v18, %v856_v54  ;;  %v1049_v45 = vmul.f32 %v1184_v33, %v2646_v60  ;;  %v1101_v46 = vmul.f32 %v2641_v57, %v2747_v40  ;;  %v567_v52 = vpop.f32.mrf.mxu0 }
 0x162   : > { %v1154_v51 = vmul.f32 %v2634_v50, %v2717_v37  ;;  %v959_v47 = vadd.f32 %v943_v62, %v907_v38  ;;  %v909_v25 = vadd.f32 %v893_v19, %v857_v8  ;;  %735 = vst [vmem:[#allocation2 + $0xd0] sm:$0xff] %v2751_v44  ;;  %v2761_v54 = vadd.f32 %v2621_v29, %v567_v52 }
 0x163   : > { %v1010_v16 = vadd.f32 %v2664_v5, %v958_v39  ;;  %v960_v53 = vadd.f32 %v944_v22, %v908_v30  ;;  %v791_v7 = vmul.f32 %v1080_v31, %v2637_v55  ;;  %v894_v9 = vmul.f32 %v1183_v32, %v2644_v59  ;;  %v1803_v17 = vpop.f32.mrf.mxu0  ;;  %v2768_v19 = vld [vmem:[#allocation2 + $0x6f] sm:$0xff] }
 0x164   : > { %v895_v14 = vmul.f32 %v1184_v33, %v2644_v59  ;;  %v1011_v18 = vadd.f32 %v2682_v15, %v959_v47  ;;  %v961_v62 = vadd.f32 %v945_v20, %v909_v25  ;;  %v2770_v22 = vld [vmem:[#allocation2 + $0x69] sm:$0xff]  ;;  %v2772_v38 = vld [vmem:[#allocation2 + $0x71] sm:$0xff]  ;;  %733 = vst [vmem:[#allocation2 + $0xb0] sm:$0xff] %v2761_v54  ;;  %v589_v31 = vadd.f32 %v1803_v17, %v2621_v29 }
 0x165   : > { %v1062_v28 = vadd.f32 %v1046_v2, %v1010_v16  ;;  %v1012_v5 = vadd.f32 %v2656_v1, %v960_v53  ;;  %v1102_v32 = vmul.f32 %v2641_v57, %v2768_v19  ;;  %v1205_v15 = vmul.f32 %v2648_v61, %v2770_v22  ;;  %v580_v1 = vpop.f32.mrf.mxu0 }
 0x166   : > { %v1206_v33 = vmul.f32 %v2648_v61, %v2772_v38  ;;  %v1063_v2 = vadd.f32 %v1047_v4, %v1011_v18  ;;  %v1013_v39 = vadd.f32 %v2672_v11, %v961_v62  ;;  %738 = vst [vmem:[#allocation2 + $0x108] sm:$0xff] %v589_v31  ;;  %v2785_v30 = vadd.f32 %v2621_v29, %v580_v1 }
 0x167   : > { %v1115_v20 = vadd.f32 %v2688_v21, %v1062_v28  ;;  %v1064_v8 = vadd.f32 %v1048_v26, %v1012_v5  ;;  %v859_v52 = vadd.f32 %v2675_v12, %v791_v7  ;;  %v910_v47 = vadd.f32 %v894_v9, %v2709_v35  ;;  %v1804_v25 = vpop.f32.mrf.mxu0  ;;  %v2800_v12 = vld [vmem:[%s3175_s4] ss:$0 sm:$0xff] }
 0x168   : > { %v946_v16 = vmul.f32 %v2747_v40, %v2639_v56  ;;  %v1116_v53 = vadd.f32 %v2720_v41, %v1063_v2  ;;  %v1065_v21 = vadd.f32 %v1049_v45, %v1013_v39  ;;  %736 = vst [vmem:[#allocation2 + $0xe8] sm:$0xff] %v2785_v30  ;;  %v2795_v11 = vadd.f32 %v1804_v25, %v2621_v29  ;;  %v2831_v25 = vld [vmem:[#allocation2 + $0x8f] sm:$0xff] }
 0x169   : > { %v1167_v4 = vadd.f32 %v2653_v0, %v1115_v20  ;;  %v1117_v17 = vadd.f32 %v1101_v46, %v1064_v8  ;;  %v911_v35 = vadd.f32 %v895_v14, %v859_v52  ;;  %v947_v26 = vmul.f32 %v2768_v19, %v2639_v56  ;;  %v583_v41 = vpop.f32.mrf.mxu0 }
 0x16a   : > { %v962_v7 = vadd.f32 %v946_v16, %v910_v47  ;;  %v1168_v0 = vadd.f32 %v2669_v10, %v1116_v53  ;;  %v1118_v46 = vadd.f32 %v1102_v32, %v1065_v21  ;;  %739 = vst [vmem:[#allocation2 + $0x110] sm:$0xff] %v2795_v11  ;;  %v2809_v18 = vadd.f32 %v2621_v29, %v583_v41  ;;  %v2841_v41 = vld [vmem:[#allocation2 + $0x89] sm:$0xff] }
 0x16b   : > { %v1219_v45 = vadd.f32 %v2723_v42, %v1167_v4  ;;  %v1169_v9 = vadd.f32 %v2707_v34, %v1117_v17  ;;  %v963_v28 = vadd.f32 %v947_v26, %v911_v35  ;;  %v999_v14 = vmul.f32 %v2632_v49, %v2717_v37  ;;  %v702_v5 = vpop.f32.mrf.mxu0 }
 0x16c   : > { %v1014_v62 = vadd.f32 %v2713_v36, %v962_v7  ;;  %v1220_v31 = vadd.f32 %v2726_v43, %v1168_v0  ;;  %v1170_v42 = vadd.f32 %v1154_v51, %v1118_v46  ;;  %737 = vst [vmem:[#allocation2 + $0xf0] sm:$0xff] %v2809_v18  ;;  %v703_v34 = vadd.f32 %v2621_v29, %v702_v5 }
 0x16d   : > { %v1242_v10 = vadd.f32 %v2800_v12, %v1219_v45  ;;  %v1221_v32 = vadd.f32 %v1205_v15, %v1169_v9  ;;  %v1015_v1 = vadd.f32 %v999_v14, %v963_v28  ;;  %v1050_v2 = vmul.f32 %v2770_v22, %v2646_v60  ;;  %v1843_v36 = vpop.f32.mrf.mxu0  ;;  %v2827_v15 = vld [vmem:[#allocation2 + $0x87] sm:$0xff]  ;;  %v1188_v14 = vld [vmem:[#allocation2 + $0x91] sm:$0xff] }
 0x16e   : > { %v2822_v20 = vmul.f32 %v2630_v48, %v2660_v3  ;;  %v1243_v39 = vadd.f32 %v2800_v12, %v1220_v31  ;;  %v1222_v8 = vadd.f32 %v1206_v33, %v1170_v42  ;;  %v1051_v51 = vmul.f32 %v2772_v38, %v2646_v60 }
 0x16f   : > { %v1274_v43 = vmul.f32 0.70710677, %v1242_v10  ;;  %v719_v52 = vmul.f32 %v2650_v63, %v703_v34  ;;  %v1244_v47 = vadd.f32 %v2800_v12, %v1221_v32  ;;  %v1066_v16 = vadd.f32 %v1050_v2, %v1014_v62  ;;  %v705_v53 = vpop.f32.mrf.mxu0 }
 0x170   : > { %v844_v3 = vmul.f32 %v2630_v48, %v2679_v13  ;;  %v1275_v4 = vmul.f32 0.70710677, %v1243_v39  ;;  %v1245_v33 = vadd.f32 %v2800_v12, %v1222_v8  ;;  %v1067_v21 = vadd.f32 %v1051_v51, %v1015_v1  ;;  %v2868_v8 = vld [vmem:[#allocation2 + $0xa7] sm:$0xff] }
 0x171   : > { %2046 = verf.f32 %v1274_v43  ;;  %741 = vst [vmem:[#allocation2 + $0x128] sm:$0xff] %v719_v52  ;;  %v706_v17 = vadd.f32 %v2621_v29, %v705_v53  ;;  %v2837_v35 = vmul.f32 0.5, %v1242_v10  ;;  %v1276_v26 = vmul.f32 0.70710677, %v1244_v47  ;;  %v1844_v0 = vpop.f32.mrf.mxu0  ;;  %v2883_v53 = vld [vmem:[#allocation2 + $0xa9] sm:$0xff] }
 0x172   : > { %v1103_v7 = vmul.f32 %v2641_v57, %v2827_v15  ;;  %v2843_v45 = vmul.f32 0.5, %v1243_v39  ;;  %2048 = verf.f32 %v1275_v4  ;;  %v1277_v13 = vmul.f32 0.70710677, %v1245_v33  ;;  %v2885_v4 = vld [vmem:[#allocation2 + $0xb1] sm:$0xff] }
 0x173   : > { %v1104_v46 = vmul.f32 %v2641_v57, %v2831_v25  ;;  %v720_v9 = vmul.f32 %v2650_v63, %v706_v17  ;;  %v2848_v28 = vmul.f32 0.5, %v1244_v47  ;;  %2050 = verf.f32 %v1276_v26 }
 0x174   : > { %v1119_v29 = vadd.f32 %v1103_v7, %v1066_v16  ;;  %2052 = verf.f32 %v1277_v13  ;;  %v1156_v5 = vmul.f32 %v2634_v50, %v2697_v24  ;;  %v1207_v31 = vmul.f32 %v2648_v61, %v2841_v41 }
 0x175   : > { %v1120_v62 = vadd.f32 %v1104_v46, %v1067_v21  ;;  %742 = vst [vmem:[#allocation2 + $0x130] sm:$0xff] %v720_v9  ;;  %v792_v42 = vmul.f32 %v2747_v40, %v2637_v55  ;;  %v793_v63 = vmul.f32 %v2768_v19, %v2637_v55  ;;  %v845_v32 = vmul.f32 %v2630_v48, %v2717_v37  ;;  %v2870_v19 = vld [vmem:[#allocation2 + $0xaf] sm:$0xff] }
 0x176   : > { %v1171_v10 = vadd.f32 %v2693_v23, %v1119_v29  ;;  %v2861_v34 = vmul.f32 0.5, %v1245_v33  ;;  %v1208_v2 = vmul.f32 %v2648_v61, %v1188_v14  ;;  %v896_v36 = vmul.f32 %v2770_v22, %v2644_v59 }
 0x177   : > { %v1172_v1 = vadd.f32 %v1156_v5, %v1120_v62  ;;  %v860_v43 = vadd.f32 %v844_v3, %v792_v42  ;;  %v861_v23 = vadd.f32 %v845_v32, %v793_v63  ;;  %v897_v40 = vmul.f32 %v2772_v38, %v2644_v59 }
 0x178   : > { %v1223_v39 = vadd.f32 %v1207_v31, %v1171_v10  ;;  %v948_v37 = vmul.f32 %v2827_v15, %v2639_v56  ;;  %v949_v52 = vmul.f32 %v2831_v25, %v2639_v56  ;;  %v1001_v22 = vmul.f32 %v2632_v49, %v2697_v24 }
 0x179   : > { %v1224_v51 = vadd.f32 %v1208_v2, %v1172_v1  ;;  %v912_v16 = vadd.f32 %v896_v36, %v860_v43  ;;  %v913_v3 = vadd.f32 %v897_v40, %v861_v23  ;;  %v1052_v38 = vmul.f32 %v2841_v41, %v2646_v60 }
 0x17a   : > { %v2879_v47 = vadd.f32 %v2800_v12, %v1223_v39  ;;  %v1053_v21 = vmul.f32 %v1188_v14, %v2646_v60  ;;  %v1105_v17 = vmul.f32 %v2641_v57, %v2868_v8  ;;  %v1106_v26 = vmul.f32 %v2641_v57, %v2870_v19 }
 0x17b   : > { %v2888_v33 = vadd.f32 %v2800_v12, %v1224_v51  ;;  %v964_v0 = vadd.f32 %v948_v37, %v912_v16  ;;  %v965_v13 = vadd.f32 %v949_v52, %v913_v3  ;;  %v1157_v46 = vmul.f32 %v2634_v50, %v2742_v6 }
 0x17c   : > { %v1278_v7 = vmul.f32 0.70710677, %v2879_v47  ;;  %v1158_v29 = vmul.f32 %v2634_v50, %v2761_v54  ;;  %v1209_v62 = vmul.f32 %v2648_v61, %v2883_v53  ;;  %v1210_v5 = vmul.f32 %v2648_v61, %v2885_v4 }
 0x17d   : > { %v1279_v9 = vmul.f32 0.70710677, %v2888_v33  ;;  %v1016_v10 = vadd.f32 %v2703_v27, %v964_v0  ;;  %v1017_v42 = vadd.f32 %v1001_v22, %v965_v13  ;;  %v794_v63 = vmul.f32 %v2827_v15, %v2637_v55 }
 0x17e   : > { %v2047_v31 = vpop.eup %2046  ;;  %2054 = verf.f32 %v1278_v7  ;;  %v795_v1 = vmul.f32 %v2831_v25, %v2637_v55  ;;  %v847_v2 = vmul.f32 %v2630_v48, %v2697_v24  ;;  %v898_v27 = vmul.f32 %v2841_v41, %v2644_v59 }
 0x17f   : > { %v1306_v32 = vadd.f32 1.0, %v2047_v31  ;;  %2056 = verf.f32 %v1279_v9  ;;  %v2049_v36 = vpop.eup %2048  ;;  %v1068_v39 = vadd.f32 %v1052_v38, %v1016_v10  ;;  %v1069_v43 = vadd.f32 %v1053_v21, %v1017_v42 }
 0x180   : > { %v862_v23 = vadd.f32 %v2822_v20, %v794_v63  ;;  %v2051_v40 = vpop.eup %2050  ;;  %v1307_v51 = vadd.f32 1.0, %v2049_v36  ;;  %v863_v37 = vadd.f32 %v847_v2, %v795_v1  ;;  %v899_v52 = vmul.f32 %v1188_v14, %v2644_v59  ;;  %v2928_v63 = vld [vmem:[#allocation2 + $0xc7] sm:$0xff] }
 0x181   : > { %v1322_v15 = vmul.f32 %v1306_v32, %v2837_v35  ;;  %v2053_v22 = vpop.eup %2052  ;;  %v1308_v25 = vadd.f32 1.0, %v2051_v40  ;;  %v1121_v16 = vadd.f32 %v1105_v17, %v1068_v39  ;;  %v1122_v3 = vadd.f32 %v1106_v26, %v1069_v43  ;;  %v2932_v32 = vld [vmem:[#allocation2 + $0xcf] sm:$0xff] }
 0x182   : > { %v914_v24 = vadd.f32 %v898_v27, %v862_v23  ;;  %v1323_v38 = vmul.f32 %v1307_v51, %v2843_v45  ;;  %v1309_v21 = vadd.f32 1.0, %v2053_v22  ;;  %v915_v7 = vadd.f32 %v899_v52, %v863_v37  ;;  %v2937_v2 = vld [vmem:[#allocation2 + $0xc9] sm:$0xff]  ;;  %v2950_v22 = vld [vmem:[#allocation2 + $0xd1] sm:$0xff] }
 0x183   : > { %v950_v20 = vmul.f32 %v2868_v8, %v2639_v56  ;;  %v1324_v41 = vmul.f32 %v1308_v25, %v2848_v28  ;;  %v1173_v0 = vadd.f32 %v1157_v46, %v1121_v16  ;;  %v1174_v13 = vadd.f32 %v1158_v29, %v1122_v3 }
 0x184   : > { %v951_v35 = vmul.f32 %v2870_v19, %v2639_v56  ;;  %v1338_v14 = vpack.c.bf16 %v1323_v38, %v1322_v15  ;;  %v1325_v9 = vmul.f32 %v1309_v21, %v2861_v34  ;;  %v1002_v26 = vmul.f32 %v2632_v49, %v2742_v6 }
 0x185   : > { %v966_v17 = vadd.f32 %v950_v20, %v914_v24  ;;  %v1225_v45 = vadd.f32 %v1209_v62, %v1173_v0  ;;  %v1226_v31 = vadd.f32 %v1210_v5, %v1174_v13  ;;  %v1003_v42 = vmul.f32 %v2632_v49, %v2761_v54 }
 0x186   : > { %v967_v10 = vadd.f32 %v951_v35, %v915_v7  ;;  %1861 = vmatprep.mubr.bf16.mxu1 %v1338_v14  ;;  %v1339_v28 = vpack.c.bf16 %v1325_v9, %v1324_v41  ;;  %v1054_v29 = vmul.f32 %v2883_v53, %v2646_v60  ;;  %v1262_v34 = vmul.f32 0.5, %v2879_v47 }
 0x187   : > { %v1018_v46 = vadd.f32 %v1002_v26, %v966_v17  ;;  %v1248_v1 = vadd.f32 %v2800_v12, %v1225_v45  ;;  %v1249_v62 = vadd.f32 %v2800_v12, %v1226_v31  ;;  %v1263_v36 = vmul.f32 0.5, %v2888_v33 }
 0x188   : > { %v1019_v5 = vadd.f32 %v1003_v42, %v967_v10  ;;  %1862 = vmatmul.mubr.bf16.vlgmr.msra.gmra.mxu1 %v1339_v28  ;;  %v1055_v39 = vmul.f32 %v2885_v4, %v2646_v60  ;;  %v1107_v23 = vmul.f32 %v2641_v57, %v2928_v63  ;;  %v1108_v47 = vmul.f32 %v2641_v57, %v2932_v32 }
 0x189   : > { %v1070_v43 = vadd.f32 %v1054_v29, %v1018_v46  ;;  %v1280_v27 = vmul.f32 0.70710677, %v1248_v1  ;;  %v1281_v40 = vmul.f32 0.70710677, %v1249_v62  ;;  %v1159_v51 = vmul.f32 %v2634_v50, %v2733_v58 }
 0x18a   : > { %v1071_v37 = vadd.f32 %v1055_v39, %v1019_v5  ;;  %v1160_v33 = vmul.f32 %v2634_v50, %v2751_v44  ;;  %v1211_v25 = vmul.f32 %v2648_v61, %v2937_v2  ;;  %v796_v24 = vmul.f32 %v2868_v8, %v2637_v55 }
 0x18b   : > { %v2055_v15 = vpop.eup %2054  ;;  %v1123_v52 = vadd.f32 %v1107_v23, %v1070_v43  ;;  %2058 = verf.f32 %v1280_v27  ;;  %v797_v38 = vmul.f32 %v2870_v19, %v2637_v55  ;;  %v1212_v41 = vmul.f32 %v2648_v61, %v2950_v22 }
 0x18c   : > { %v2057_v16 = vpop.eup %2056  ;;  %v1310_v3 = vadd.f32 1.0, %v2055_v15  ;;  %2060 = verf.f32 %v1281_v40  ;;  %v1124_v7 = vadd.f32 %v1108_v47, %v1071_v37  ;;  %v848_v0 = vmul.f32 %v2630_v48, %v2742_v6 }
 0x18d   : > { %v1311_v21 = vadd.f32 1.0, %v2057_v16  ;;  %v1175_v20 = vadd.f32 %v1159_v51, %v1123_v52  ;;  %v849_v13 = vmul.f32 %v2630_v48, %v2761_v54  ;;  %v900_v35 = vmul.f32 %v2883_v53, %v2644_v59 }
 0x18e   : > { %v1326_v8 = vmul.f32 %v1310_v3, %v1262_v34  ;;  %v1176_v9 = vadd.f32 %v1160_v33, %v1124_v7  ;;  %v1264_v17 = vmul.f32 0.5, %v1248_v1  ;;  %v864_v26 = vadd.f32 %v848_v0, %v796_v24  ;;  %v2973_v34 = vld [vmem:[#allocation2 + $0xe7] sm:$0xff]  ;;  %v3006_v0 = vld [vmem:[#allocation2 + $0xf1] sm:$0xff] }
 0x18f   : > { %v1327_v14 = vmul.f32 %v1311_v21, %v1263_v36  ;;  %v1227_v19 = vadd.f32 %v1211_v25, %v1175_v20  ;;  %v865_v45 = vadd.f32 %v849_v13, %v797_v38  ;;  %v901_v31 = vmul.f32 %v2885_v4, %v2644_v59  ;;  %v2980_v36 = vld [vmem:[#allocation2 + $0xef] sm:$0xff] }
 0x190   : > { %v1265_v42 = vmul.f32 0.5, %v1249_v62  ;;  %v1228_v28 = vadd.f32 %v1212_v41, %v1176_v9  ;;  %v916_v46 = vadd.f32 %v900_v35, %v864_v26  ;;  %v952_v53 = vmul.f32 %v2928_v63, %v2639_v56  ;;  %v2994_v25 = vld [vmem:[#allocation2 + $0xe9] sm:$0xff] }
 0x191   : > { %v1340_v10 = vpack.c.bf16 %v1327_v14, %v1326_v8  ;;  %v1250_v6 = vadd.f32 %v2800_v12, %v1227_v19  ;;  %v917_v54 = vadd.f32 %v901_v31, %v865_v45  ;;  %v953_v29 = vmul.f32 %v2932_v32, %v2639_v56 }
 0x192   : > { %v1251_v1 = vadd.f32 %v2800_v12, %v1228_v28  ;;  %v1004_v4 = vmul.f32 %v2632_v49, %v2733_v58  ;;  %v1005_v62 = vmul.f32 %v2632_v49, %v2751_v44  ;;  %v968_v43 = vadd.f32 %v952_v53, %v916_v46 }
 0x193   : > { %1865 = vmatprep.mubr.bf16.mxu1 %v1340_v10  ;;  %v1282_v5 = vmul.f32 0.70710677, %v1250_v6  ;;  %v2982_v39 = vmul.f32 0.5, %v1250_v6  ;;  %v969_v23 = vadd.f32 %v953_v29, %v917_v54  ;;  %v1056_v27 = vmul.f32 %v2937_v2, %v2646_v60 }
 0x194   : > { %v1283_v40 = vmul.f32 0.70710677, %v1251_v1  ;;  %v1057_v47 = vmul.f32 %v2950_v22, %v2646_v60  ;;  %v1109_v51 = vmul.f32 %v2641_v57, %v2973_v34  ;;  %v2990_v15 = vmul.f32 0.5, %v1251_v1  ;;  %v1091_v1 = vld [vmem:[#allocation2 + $0x107] sm:$0xff] }
 0x195   : > { %2062 = verf.f32 %v1282_v5  ;;  %v1020_v37 = vadd.f32 %v1004_v4, %v968_v43  ;;  %v1021_v52 = vadd.f32 %v1005_v62, %v969_v23  ;;  %v1110_v33 = vmul.f32 %v2641_v57, %v2980_v36  ;;  %v1092_v43 = vld [vmem:[#allocation2 + $0x10f] sm:$0xff] }
 0x196   : > { %2064 = verf.f32 %v1283_v40  ;;  %v1161_v16 = vmul.f32 %v2634_v50, %v2785_v30  ;;  %v798_v3 = vmul.f32 %v2928_v63, %v2637_v55  ;;  %v799_v24 = vmul.f32 %v2932_v32, %v2637_v55  ;;  %v1143_v23 = vld [vmem:[#allocation2 + $0x108] sm:$0xff] }
 0x197   : > { %v1072_v38 = vadd.f32 %v1056_v27, %v1020_v37  ;;  %v1073_v21 = vadd.f32 %v1057_v47, %v1021_v52  ;;  %v1162_v7 = vmul.f32 %v2634_v50, %v2809_v18  ;;  %v850_v20 = vmul.f32 %v2630_v48, %v2733_v58 }
 0x198   : > { %v2059_v41 = vpop.eup %2058  ;;  %v1213_v13 = vmul.f32 %v2648_v61, %v2994_v25  ;;  %v851_v63 = vmul.f32 %v2630_v48, %v2751_v44  ;;  %v902_v32 = vmul.f32 %v2937_v2, %v2644_v59  ;;  %v954_v35 = vmul.f32 %v2973_v34, %v2639_v56 }
 0x199   : > { %v2061_v8 = vpop.eup %2060  ;;  %v1312_v14 = vadd.f32 1.0, %v2059_v41  ;;  %v1125_v9 = vadd.f32 %v1109_v51, %v1072_v38  ;;  %v1126_v19 = vadd.f32 %v1110_v33, %v1073_v21  ;;  %v866_v58 = vadd.f32 %v850_v20, %v798_v3  ;;  %v833_v38 = vld [vmem:[#allocation2 + $0xf0] sm:$0xff] }
 0x19a   : > { %v1313_v26 = vadd.f32 1.0, %v2061_v8  ;;  %v867_v45 = vadd.f32 %v851_v63, %v799_v24  ;;  %v903_v31 = vmul.f32 %v2950_v22, %v2644_v59  ;;  %v955_v10 = vmul.f32 %v2980_v36, %v2639_v56  ;;  %v832_v24 = vld [vmem:[#allocation2 + $0xe8] sm:$0xff]  ;;  %v1196_v41 = vld [vmem:[#allocation2 + $0x111] sm:$0xff] }
 0x19b   : > { %v1177_v44 = vadd.f32 %v1161_v16, %v1125_v9  ;;  %v1178_v28 = vadd.f32 %v1162_v7, %v1126_v19  ;;  %v1214_v2 = vmul.f32 %v2648_v61, %v3006_v0  ;;  %v918_v6 = vadd.f32 %v902_v32, %v866_v58 }
 0x19c   : > { %v1328_v46 = vmul.f32 %v1312_v14, %v1264_v17  ;;  %v1329_v54 = vmul.f32 %v1313_v26, %v1265_v42  ;;  %v919_v53 = vadd.f32 %v903_v31, %v867_v45  ;;  %v1006_v29 = vmul.f32 %v2632_v49, %v2785_v30  ;;  %v1195_v42 = vld [vmem:[#allocation2 + $0x109] sm:$0xff] }
 0x19d   : > { %v1229_v5 = vadd.f32 %v1213_v13, %v1177_v44  ;;  %v1230_v4 = vadd.f32 %v1214_v2, %v1178_v28  ;;  %v970_v62 = vadd.f32 %v954_v35, %v918_v6  ;;  %v1007_v22 = vmul.f32 %v2632_v49, %v2809_v18  ;;  %v989_v6 = vld [vmem:[#allocation2 + $0x110] sm:$0xff] }
 0x19e   : > { %v1341_v27 = vpack.c.bf16 %v1329_v54, %v1328_v46  ;;  %v971_v40 = vadd.f32 %v955_v10, %v919_v53  ;;  %v1058_v47 = vmul.f32 %v2994_v25, %v2646_v60  ;;  %v1059_v17 = vmul.f32 %v3006_v0, %v2646_v60 }
 0x19f   : > { %v3031_v30 = vadd.f32 %v2800_v12, %v1229_v5  ;;  %v3034_v51 = vadd.f32 %v2800_v12, %v1230_v4  ;;  %v1022_v37 = vadd.f32 %v1006_v29, %v970_v62  ;;  %v1111_v18 = vmul.f32 %v2641_v57, %v1091_v1 }
 0x1a0   : > { %1866 = vmatmul.mubr.bf16.gmra.mxu1 %v1341_v27  ;;  %v1023_v52 = vadd.f32 %v1007_v22, %v971_v40  ;;  %v1112_v33 = vmul.f32 %v2641_v57, %v1092_v43  ;;  %v1163_v16 = vmul.f32 %v2634_v50, %v1143_v23  ;;  %v1164_v3 = vmul.f32 %v2634_v50, %v2795_v11  ;;  %v1094_v27 = vld [vmem:[#allocation2 + $0x12f] sm:$0xff] }
 0x1a1   : > { %v1284_v7 = vmul.f32 0.70710677, %v3031_v30  ;;  %v1285_v20 = vmul.f32 0.70710677, %v3034_v51  ;;  %v1215_v13 = vmul.f32 %v2648_v61, %v1195_v42  ;;  %v800_v63 = vmul.f32 %v2973_v34, %v2637_v55 }
 0x1a2   : > { %v2063_v21 = vpop.eup %2062  ;;  %v1074_v35 = vadd.f32 %v1058_v47, %v1022_v37  ;;  %v1075_v8 = vadd.f32 %v1059_v17, %v1023_v52  ;;  %v801_v14 = vmul.f32 %v2980_v36, %v2637_v55  ;;  %v852_v9 = vmul.f32 %v2630_v48, %v832_v24  ;;  %v1145_v17 = vld [vmem:[#allocation2 + $0x128] sm:$0xff]  ;;  %v1198_v24 = vld [vmem:[#allocation2 + $0x131] sm:$0xff] }
 0x1a3   : > { %v1314_v32 = vadd.f32 1.0, %v2063_v21  ;;  %v2065_v11 = vpop.eup %2064  ;;  %2066 = verf.f32 %v1284_v7  ;;  %v853_v19 = vmul.f32 %v2630_v48, %v833_v38  ;;  %v904_v58 = vmul.f32 %v2994_v25, %v2644_v59 }
 0x1a4   : > { %v1315_v26 = vadd.f32 1.0, %v2065_v11  ;;  %2068 = verf.f32 %v1285_v20  ;;  %v1127_v45 = vadd.f32 %v1111_v18, %v1074_v35  ;;  %v1216_v34 = vmul.f32 %v2648_v61, %v1196_v41  ;;  %v1146_v18 = vld [vmem:[#allocation2 + $0x130] sm:$0xff] }
 0x1a5   : > { %v1128_v31 = vadd.f32 %v1112_v33, %v1075_v8  ;;  %v868_v10 = vadd.f32 %v852_v9, %v800_v63  ;;  %v869_v44 = vadd.f32 %v853_v19, %v801_v14  ;;  %v905_v55 = vmul.f32 %v3006_v0, %v2644_v59  ;;  %v1093_v0 = vld [vmem:[#allocation2 + $0x127] sm:$0xff] }
 0x1a6   : > { %v1330_v36 = vmul.f32 %v1314_v32, %v2982_v39  ;;  %v1331_v28 = vmul.f32 %v1315_v26, %v2990_v15  ;;  %v1179_v2 = vadd.f32 %v1163_v16, %v1127_v45  ;;  %v956_v48 = vmul.f32 %v1091_v1, %v2639_v56 }
 0x1a7   : > { %v1180_v25 = vadd.f32 %v1164_v3, %v1128_v31  ;;  %v920_v46 = vadd.f32 %v904_v58, %v868_v10  ;;  %v921_v54 = vadd.f32 %v905_v55, %v869_v44  ;;  %v957_v53 = vmul.f32 %v1092_v43, %v2639_v56  ;;  %v1197_v3 = vld [vmem:[#allocation2 + $0x129] sm:$0xff] }
 0x1a8   : > { %v1342_v29 = vpack.c.bf16 %v1331_v28, %v1330_v36  ;;  %v1231_v5 = vadd.f32 %v1215_v13, %v1179_v2  ;;  %v1008_v4 = vmul.f32 %v1143_v23, %v2632_v49  ;;  %v1009_v39 = vmul.f32 %v2632_v49, %v989_v6 }
 0x1a9   : > { %v1232_v62 = vadd.f32 %v1216_v34, %v1180_v25  ;;  %v972_v22 = vadd.f32 %v956_v48, %v920_v46  ;;  %v973_v59 = vadd.f32 %v957_v53, %v921_v54  ;;  %v1060_v1 = vmul.f32 %v1195_v42, %v2646_v60 }
 0x1aa   : > { %1869 = vmatprep.mubr.bf16.mxu1 %v1342_v29  ;;  %v1254_v15 = vadd.f32 %v2800_v12, %v1231_v5  ;;  %v1061_v43 = vmul.f32 %v1196_v41, %v2646_v60  ;;  %v1113_v37 = vmul.f32 %v2641_v57, %v1093_v0  ;;  %v1114_v16 = vmul.f32 %v2641_v57, %v1094_v27 }
 0x1ab   : > { %v1255_v40 = vadd.f32 %v2800_v12, %v1232_v62  ;;  %v1024_v47 = vadd.f32 %v1008_v4, %v972_v22  ;;  %v1025_v56 = vadd.f32 %v1009_v39, %v973_v59  ;;  %v1165_v42 = vmul.f32 %v2634_v50, %v1145_v17  ;;  %v1709_v4 = vld [vmem:[%s3177_s6] ss:$0 sm:$0xff] }
 0x1ac   : > { %v1286_v23 = vmul.f32 0.70710677, %v1254_v15  ;;  %v1166_v60 = vmul.f32 %v2634_v50, %v1146_v18  ;;  %v1217_v20 = vmul.f32 %v2648_v61, %v1197_v3  ;;  %v1218_v35 = vmul.f32 %v2648_v61, %v1198_v24 }
 0x1ad   : > { %v1287_v52 = vmul.f32 0.70710677, %v1255_v40  ;;  %v1076_v49 = vadd.f32 %v1060_v1, %v1024_v47  ;;  %v1077_v33 = vadd.f32 %v1061_v43, %v1025_v56  ;;  %v1268_v57 = vmul.f32 0.5, %v3031_v30 }
 0x1ae   : > { %2070 = verf.f32 %v1286_v23  ;;  %v1269_v8 = vmul.f32 0.5, %v3034_v51  ;;  %v1270_v44 = vmul.f32 0.5, %v1254_v15  ;;  %v1271_v51 = vmul.f32 0.5, %v1255_v40 }
 0x1af   : > { %2072 = verf.f32 %v1287_v52  ;;  %v1129_v38 = vadd.f32 %v1113_v37, %v1076_v49  ;;  %v1130_v21 = vadd.f32 %v1114_v16, %v1077_v33 }
 0x1b0   : > { %v2067_v7 = vpop.eup %2066 }
 0x1b1   : > { %v2069_v41 = vpop.eup %2068  ;;  %v1316_v13 = vadd.f32 1.0, %v2067_v7  ;;  %v1181_v63 = vadd.f32 %v1165_v42, %v1129_v38  ;;  %v1182_v32 = vadd.f32 %v1166_v60, %v1130_v21 }
 0x1b2   : > { %v1317_v14 = vadd.f32 1.0, %v2069_v41 }
 0x1b3   : > { %v1233_v11 = vadd.f32 %v1217_v20, %v1181_v63  ;;  %v1234_v9 = vadd.f32 %v1218_v35, %v1182_v32  ;;  %v1332_v19 = vmul.f32 %v1316_v13, %v1268_v57 }
 0x1b4   : > { %v1333_v58 = vmul.f32 %v1317_v14, %v1269_v8 }
 0x1b5   : > { %v1256_v50 = vadd.f32 %v2800_v12, %v1233_v11  ;;  %v1257_v26 = vadd.f32 %v2800_v12, %v1234_v9 }
 0x1b6   : > { %v1343_v45 = vpack.c.bf16 %v1333_v58, %v1332_v19 }
 0x1b7   : > { %v1288_v34 = vmul.f32 0.70710677, %v1256_v50  ;;  %v1289_v31 = vmul.f32 0.70710677, %v1257_v26  ;;  %v1272_v25 = vmul.f32 0.5, %v1256_v50  ;;  %v1273_v46 = vmul.f32 0.5, %v1257_v26 }
 0x1b8   : > { %1870 = vmatmul.mubr.bf16.gmra.mxu1 %v1343_v45 }
 0x1b9   : > { %2074 = verf.f32 %v1288_v34 }
 0x1ba   : > { %2076 = verf.f32 %v1289_v31 }
 0x1bb   : > { %v2071_v61 = vpop.eup %2070 }
 0x1bc   : > { %v2073_v10 = vpop.eup %2072  ;;  %v1318_v30 = vadd.f32 1.0, %v2071_v61 }
 0x1bd   : > { %v1319_v55 = vadd.f32 1.0, %v2073_v10 }
 0x1be   : > { %v1334_v36 = vmul.f32 %v1318_v30, %v1270_v44 }
 0x1bf   : > { %v1335_v28 = vmul.f32 %v1319_v55, %v1271_v51 }
 0x1c1   : > { %v1344_v2 = vpack.c.bf16 %v1335_v28, %v1334_v36 }
 0x1c3   : > { %1873 = vmatprep.mubr.bf16.mxu1 %v1344_v2 }
 0x1c6   : > { %v2075_v48 = vpop.eup %2074 }
 0x1c7   : > { %v2077_v12 = vpop.eup %2076  ;;  %v1320_v6 = vadd.f32 1.0, %v2075_v48 }
 0x1c8   : > { %v1321_v54 = vadd.f32 1.0, %v2077_v12 }
 0x1c9   : > { %v1336_v53 = vmul.f32 %v1320_v6, %v1272_v25 }
 0x1ca   : > { %v1337_v29 = vmul.f32 %v1321_v54, %v1273_v46 }
 0x1cc   : > { %v1345_v5 = vpack.c.bf16 %v1337_v29, %v1336_v53 }
 0x1ce   : > { %1874 = vmatmul.mubr.bf16.gmra.mxu1 %v1345_v5 }
 0x248   : > { %v1863_v62 = vpop.f32.mrf.mxu1 }
 0x249   : > { %v1460_v22 = vadd.f32 %v1863_v62, %v1709_v4 }
 0x24a   : > { %v1451_v59 = vpop.f32.mrf.mxu1 }
 0x24b   : > { %1516 = vst [vmem:[%s3081_s1 + $0x10] sm:$0xff] %v1460_v22  ;;  %v1452_v39 = vadd.f32 %v1709_v4, %v1451_v59 }
 0x24c   : > { %v1864_v0 = vpop.f32.mrf.mxu1 }
 0x24d   : > { %1514 = vst [vmem:[%s3081_s1] sm:$0xff] %v1452_v39  ;;  %v1463_v15 = vadd.f32 %v1864_v0, %v1709_v4 }
 0x24e   : > { %v1454_v1 = vpop.f32.mrf.mxu1 }
 0x24f   : > { %1517 = vst [vmem:[%s3081_s1 + $0x18] sm:$0xff] %v1463_v15  ;;  %v1455_v27 = vadd.f32 %v1709_v4, %v1454_v1 }
 0x251   : > { %1515 = vst [vmem:[%s3081_s1 + $0x8] sm:$0xff] %v1455_v27 }
 0x260   : > { %v1867_v40 = vpop.f32.mrf.mxu1 }
 0x261   : > { %v1476_v47 = vadd.f32 %v1867_v40, %v1709_v4 }
 0x262   : > { %v1467_v56 = vpop.f32.mrf.mxu1 }
 0x263   : > { %1520 = vst [vmem:[%s3081_s1 + $0x30] sm:$0xff] %v1476_v47  ;;  %v1468_v43 = vadd.f32 %v1709_v4, %v1467_v56 }
 0x264   : > { %v1868_v17 = vpop.f32.mrf.mxu1 }
 0x265   : > { %1518 = vst [vmem:[%s3081_s1 + $0x20] sm:$0xff] %v1468_v43  ;;  %v1479_v23 = vadd.f32 %v1868_v17, %v1709_v4 }
 0x266   : > { %v1470_v37 = vpop.f32.mrf.mxu1 }
 0x267   : > { %1521 = vst [vmem:[%s3081_s1 + $0x38] sm:$0xff] %v1479_v23  ;;  %v1471_v18 = vadd.f32 %v1709_v4, %v1470_v37 }
 0x269   : > { %1519 = vst [vmem:[%s3081_s1 + $0x28] sm:$0xff] %v1471_v18 }
 0x278   : > { %v1871_v52 = vpop.f32.mrf.mxu1 }
 0x279   : > { %v1492_v49 = vadd.f32 %v1871_v52, %v1709_v4 }
 0x27a   : > { %v1483_v33 = vpop.f32.mrf.mxu1 }
 0x27b   : > { %1524 = vst [vmem:[%s3081_s1 + $0x50] sm:$0xff] %v1492_v49  ;;  %v1484_v16 = vadd.f32 %v1709_v4, %v1483_v33 }
 0x27c   : > { %v1872_v3 = vpop.f32.mrf.mxu1 }
 0x27d   : > { %1522 = vst [vmem:[%s3081_s1 + $0x40] sm:$0xff] %v1484_v16  ;;  %v1495_v42 = vadd.f32 %v1872_v3, %v1709_v4 }
 0x27e   : > { %v1486_v24 = vpop.f32.mrf.mxu1 }
 0x27f   : > { %1525 = vst [vmem:[%s3081_s1 + $0x58] sm:$0xff] %v1495_v42  ;;  %v1487_v38 = vadd.f32 %v1709_v4, %v1486_v24 }
 0x281   : > { %1523 = vst [vmem:[%s3081_s1 + $0x48] sm:$0xff] %v1487_v38 }
 0x28e   : > { %v1875_v21 = vpop.f32.mrf.mxu1 }
 0x28f   : > { %v1508_v60 = vadd.f32 %v1875_v21, %v1709_v4 }
 0x290   : > { %v1499_v7 = vpop.f32.mrf.mxu1 }
 0x291   : > { %1528 = vst [vmem:[%s3081_s1 + $0x70] sm:$0xff] %v1508_v60  ;;  %v1500_v20 = vadd.f32 %v1709_v4, %v1499_v7 }
 0x292   : > { %v1876_v41 = vpop.f32.mrf.mxu1 }
 0x293   : > { %1526 = vst [vmem:[%s3081_s1 + $0x60] sm:$0xff] %v1500_v20  ;;  %v1511_v13 = vadd.f32 %v1876_v41, %v1709_v4 }
 0x294   : > { %v1502_v63 = vpop.f32.mrf.mxu1 }
 0x295   : > { %1529 = vst [vmem:[%s3081_s1 + $0x78] sm:$0xff] %v1511_v13  ;;  %v1503_v32 = vadd.f32 %v1709_v4, %v1502_v63 }
 0x297   : > { %1527 = vst [vmem:[%s3081_s1 + $0x68] sm:$0xff] %v1503_v32 }
 0x298   : > { %2197 = shalt.err (!%p2194_p2)
}
 0x299   : > { %s2198_s22 = scalar_lea.hbm %s3106_s9, 2048  ;;  %s2202_s21 = scalar_lea.hbm %s3218_s14, 12288 }
 0x29a   : > { %p2199_p5 = scmp.ne.s32.totalorder %s3106_s9, %s2198_s22  ;;  %p2203_p3 = scmp.lt.s32.totalorder %s3106_s9, %s3218_s14 }
 0x29b   : > { %p2204_p7 = scmp.lt.s32.totalorder %s2202_s21, %s2198_s22 }
 0x29c   : > { %p2200_p6 = pnand %p2199_p5, %p3219_p13 }
 0x29d   : > { %p2205_p11 = por %p2204_p7, %p2203_p3 }
 0x29e   : > { %p2201_p1 = pneg %p2200_p6 }
 0x2a0   : > { %p2206_p4 = pnand %p2205_p11, %p2201_p1 }
 0x2a2   : > { %2209 = shalt.err (!%p2206_p4)
}
 0x2a3   : > { %s2323_s18 = smov 128   ;;  %s2324_s30 = smov 8  }
 0x2a4   : > { %1895 = dma.vmem_to_hbm [thread:$0]  (%p3219_p13), %s3100_s15, 2048, %s3106_s9, %s3111_s16, %s2323_s18, %s2323_s18, %s2324_s30  }
 0x2a5 PF: > { %s3220_s7 = sld [smem:[#allocation16_spill]]  ;;  %p1922_p8 = scmp.ge.s32.totalorder %s2312_s11, 2 }
 0x2a6   : > { %s3221_s8 = sld [smem:[#allocation20_spill]] }
 0x2ab   : > { %s1561_s19 = sand.u32 1, %s3220_s7  }
 0x2ac   : > { %p3222_p10 = scmp.ne.s32.totalorder %s3221_s8, 0  ;;  %s1562_s24 = scalar_lea.sflag [#allocation5], %s1561_s19 }
 0x2ae   : > { %p1912_p9 = pnand %p1922_p8, %p3222_p10 }
 0x2b0   : > { %p1913_p0 = pneg %p1912_p9 }
 0x2b2   : > { %2267 = dma.done.wait (%p1913_p0), %s1562_s24, 2048  }
 0x2b3   : > { %2269 = vsyncadd (%p1913_p0), %s1562_s24, 4294965248  ;;  %s25_s11 = sadd.s32 1, %s2312_s11   ;;  %s3223_s30 = sld [smem:[#allocation18_spill]] }
 0x2b4   : > { %p22_p12 = scmp.ge.s32.totalorder %s25_s11, 8   ;;  %s3224_s9 = sld [smem:[#allocation21_spill]] }
 0x2b5   : > { %s3225_s13 = sld [smem:[#allocation22_spill]]  ;;  %s3226_s24 = smov %s2276_s25 }
 0x2b6   : > { %s3227_s25 = smov %s2280_s26  ;;  %s3228_s26 = smov %s2521_s3 }
 0x2b7   : > { %s3229_s27 = smov %s2288_s28  ;;  %s3230_s28 = smov %s2292_s29 }
 0x2b8   : > { %s3231_s29 = smov %s2516_s23  ;;  %s3232_s8 = smov %s2308_s10 }
 0x2b9   :  { %24 = sbr.rel (!%p22_p12) target bundleno = 16 (0x10), region = 111 }
 0x2bb   : > { %s3233_s10 = smov %s3225_s13 }
 0x2be   :  { %1567 = vsyncpa [#allocation4], 1 }
 0x2bf   :  { %1569 = vsyncpa [#allocation4 + $0x1], 1 }
 0x2c0   :  { %1570 = vsyncpa [#allocation7], 1 }
 0x2c1   :  { %1571 = vsyncpa [#allocation10], 1 }
 0x2c2   :  { %1572 = vsyncpa [#allocation5], 1 }
 0x2c3   :  { %1574 = vsyncpa [#allocation5 + $0x1], 1 }

</bundles_post_ra>
